<compile_context>
chip_gen: v6e
topology: v6e:2x2x1
jax: 0.10.0
libtpu: 0.0.40
codegen_flags: <defaults>
</compile_context>

<pallas_src>
import functools

import jax
import jax.numpy as jnp
from jax import lax
from jax.experimental import pallas as pl
from jax.experimental.pallas import tpu as pltpu

H_PAD = 128      # hidden dim padded to a full 128-lane group (per-gate slot width)
B_PAD = 8        # batch padded to a full 8-sublane group
NTAG_PAD = 128   # lane-dense output width


def _lstm_kernel(xg_ref, len_ref, whh_ref, h0_ref, c0_ref, wout_ref, bout_ref,
                 out_ref, hseq_ref, *, T):
    """Recurrence + output head for one (small) batch.

    xg_ref  : (T, B_PAD, 4*H_PAD) f32  gate pre-activations from the fused
                                       embedding/input-projection table (+bias)
    len_ref : (B_PAD, 1)          i32  sequence lengths (0 for padded rows)
    whh_ref : (H_PAD, 4*H_PAD)    bf16 hidden->gate weights (gate order i,f,g,o)
    h0_ref  : (B_PAD, H_PAD)      f32  initial hidden state
    c0_ref  : (B_PAD, H_PAD)      f32  initial cell state
    wout_ref: (H_PAD, NTAG_PAD)   bf16 output projection (pad cols zero)
    bout_ref: (1, NTAG_PAD)       f32  output bias (pad lanes -1e30)
    out_ref : (T, B_PAD, NTAG_PAD) f32 log-probabilities (lane-dense, padded)
    hseq_ref: (T, B_PAD, H_PAD)   f32  VMEM scratch: masked hidden sequence
    """
    H = H_PAD
    whh = whh_ref[...]           # stays resident across the whole recurrence
    len_col = len_ref[...]       # (B_PAD, 1) int32

    # TODO(synk): keep whh stationary in the MXU across steps with
    # pltpu.matmul_push_rhs / matmul_acc_lhs / matmul_pop (and on v7x fold the
    # `xg + h@whh` add into the MRB accumulator).
    def step(t, carry):
        h, c = carry                                              # (B_PAD, H_PAD) f32
        # One MXU push per step; xg_ref[t] is a zero-cost ref view.
        g = xg_ref[t] + jnp.dot(h.astype(jnp.bfloat16), whh,
                                preferred_element_type=jnp.float32)  # (B_PAD, 4*H_PAD)
        # Gate slices land exactly on 128-lane vreg boundaries.
        i_g = jax.nn.sigmoid(g[:, 0:H])
        f_g = jax.nn.sigmoid(g[:, H:2 * H])
        g_g = jnp.tanh(g[:, 2 * H:3 * H])
        o_g = jax.nn.sigmoid(g[:, 3 * H:4 * H])
        c_new = f_g * c + i_g * g_g
        h_new = o_g * jnp.tanh(c_new)

        # pack_padded_sequence semantics: freeze state past each length.
        valid = (t < len_col).astype(jnp.float32)                 # (B_PAD, 1)
        h = h + valid * (h_new - h)
        c = c + valid * (c_new - c)
        # pad_packed_sequence semantics: outputs past length are exactly 0.
        hseq_ref[t] = valid * h      # lane-dense (8,128) store, off the dep chain
        return h, c

    lax.fori_loop(0, T, step, (h0_ref[...], c0_ref[...]), unroll=min(T, 8))

    # ---------- batched output head: projection + log_softmax ------------
    h_all = hseq_ref[...].reshape(T * B_PAD, H_PAD)
    logits = jnp.dot(h_all.astype(jnp.bfloat16), wout_ref[...],
                     preferred_element_type=jnp.float32) + bout_ref[...]
    m = jnp.max(logits, axis=1, keepdims=True)
    lse = jnp.log(jnp.sum(jnp.exp(logits - m), axis=1, keepdims=True)) + m
    out_ref[...] = (logits - lse).reshape(out_ref.shape)   # lane-dense store


def my_lstm_forward(ids_bt, lengths, params, n_tag):
    """ids_bt: (B, T) int32, lengths: (B,) int32.
    Returns (B, T, n_tag) float32 log-probabilities."""
    w_fused_pad, b_gate_pad, whh_pad, h0_pad, c0_pad, wout_pad, bout_pad = params
    B, T = ids_bt.shape

    # Fused embedding + input projection: a single row gather per token.
    # TODO(synk): at realistic vocab sizes keep w_fused in HBM
    # (BlockSpec(memory_space=pl.ANY)) and gather rows with scalar-prefetch DMA
    # instead of a wrapper-side jnp.take.
    xg_bt = jnp.take(w_fused_pad, ids_bt, axis=0) + b_gate_pad[None, None, :]  # (B,T,4H_PAD)
    xg_tb = jnp.transpose(xg_bt, (1, 0, 2))                                    # (T,B,4H_PAD)
    xg_pad = jnp.zeros((T, B_PAD, 4 * H_PAD), jnp.float32).at[:, :B, :].set(xg_tb)

    lengths_pad = jnp.zeros((B_PAD, 1), jnp.int32).at[:B, 0].set(
        lengths.astype(jnp.int32))

    kernel = functools.partial(_lstm_kernel, T=T)
    vmem = pl.BlockSpec(memory_space=pltpu.MemorySpace.VMEM)

    operand_bytes = int(
        xg_pad.size * 4 + lengths_pad.size * 4 + whh_pad.size * 2
        + h0_pad.size * 4 + c0_pad.size * 4 + wout_pad.size * 2
        + bout_pad.size * 4 + T * B_PAD * NTAG_PAD * 4      # output
        + T * B_PAD * H_PAD * 4)                            # hseq scratch
    flops = int(T * 2 * B_PAD * H_PAD * 4 * H_PAD           # recurrence matmuls
                + 2 * T * B_PAD * H_PAD * NTAG_PAD          # output projection
                + 16 * T * B_PAD * H_PAD)                   # pointwise gate math
    transcendentals = int(5 * T * B_PAD * H_PAD + T * B_PAD * NTAG_PAD)

    # TODO(synk): at realistic B/T, add a batch-block grid with
    # dimension_semantics=("parallel",) (uses both v7x TensorCores) and tile
    # the output head over ~512-row blocks for DMA/compute overlap.
    out_pad = pl.pallas_call(
        kernel,
        out_shape=jax.ShapeDtypeStruct((T, B_PAD, NTAG_PAD), jnp.float32),
        in_specs=[vmem] * 7,
        out_specs=vmem,
        scratch_shapes=[pltpu.VMEM((T, B_PAD, H_PAD), jnp.float32)],
        compiler_params=pltpu.CompilerParams(
            vmem_limit_bytes=int(max(4 << 20, 4 * operand_bytes))),
        cost_estimate=pl.CostEstimate(flops=flops,
                                      transcendentals=transcendentals,
                                      bytes_accessed=operand_bytes),
    )(xg_pad, lengths_pad, whh_pad, h0_pad, c0_pad, wout_pad, bout_pad)

    out = out_pad[:, :B, :n_tag]                 # drop padded batch rows / tag lanes
    return jnp.transpose(out, (1, 0, 2))         # (B, T, n_tag)


def init_params(key, V, E, H, NTAG, B, pad_idx=0):
    ks = jax.random.split(key, 9)

    # Embedding: N(0,1), padding row zeroed (nn.Embedding padding_idx).
    emb = jax.random.normal(ks[0], (V, E), jnp.float32).at[pad_idx].set(0.0)

    # LSTM weights: uniform(-1/sqrt(H), 1/sqrt(H)), PyTorch gate order i,f,g,o.
    s = 1.0 / jnp.sqrt(H)
    w_ih = jax.random.uniform(ks[1], (4 * H, E), jnp.float32, -s, s)
    w_hh = jax.random.uniform(ks[2], (4 * H, H), jnp.float32, -s, s)
    b_ih = jax.random.uniform(ks[3], (4 * H,), jnp.float32, -s, s)
    b_hh = jax.random.uniform(ks[4], (4 * H,), jnp.float32, -s, s)

    # Fused table: emb-lookup followed by x @ W_ih^T == row gather of emb @ W_ih^T.
    w_fused = emb @ jnp.transpose(w_ih)          # (V, 4H), gate order i,f,g,o
    b_gate = b_ih + b_hh                         # (4H,)
    w_hh_cat = jnp.transpose(w_hh)               # (H, 4H)

    # Lay each gate into its own 128-lane slot (padded lanes are zero so the
    # padded hidden lanes stay exactly zero through the recurrence).
    def pad_gate_cols(a):                        # (R, 4H) -> (R, 4*H_PAD)
        out = jnp.zeros((a.shape[0], 4 * H_PAD), a.dtype)
        for k in range(4):
            out = out.at[:, k * H_PAD:k * H_PAD + H].set(a[:, k * H:(k + 1) * H])
        return out

    w_fused_pad = pad_gate_cols(w_fused)                             # (V, 4*H_PAD) f32
    b_gate_pad = pad_gate_cols(b_gate[None, :])[0]                   # (4*H_PAD,)  f32
    whh_pad = (jnp.zeros((H_PAD, 4 * H_PAD), jnp.float32)
               .at[:H, :].set(pad_gate_cols(w_hh_cat))
               .astype(jnp.bfloat16))                                # bf16 on MXU

    # Initial hidden/cell: torch.randn(n_layers, B, H) -> squeeze layer dim; pad with zeros.
    h0 = jax.random.normal(ks[5], (B, H), jnp.float32)
    c0 = jax.random.normal(ks[6], (B, H), jnp.float32)
    h0_pad = jnp.zeros((B_PAD, H_PAD), jnp.float32).at[:B, :H].set(h0)
    c0_pad = jnp.zeros((B_PAD, H_PAD), jnp.float32).at[:B, :H].set(c0)

    # Output Linear(H -> NTAG), lane-padded to 128 columns: padded columns get
    # zero weight and a -1e30 bias so they vanish from the softmax (and are
    # sliced off before any consumer).
    so = 1.0 / jnp.sqrt(H)
    w_out = jax.random.uniform(ks[7], (NTAG, H), jnp.float32, -so, so)
    b_out = jax.random.uniform(ks[8], (NTAG,), jnp.float32, -so, so)
    wout_pad = (jnp.zeros((H_PAD, NTAG_PAD), jnp.float32)
                .at[:H, :NTAG].set(jnp.transpose(w_out))
                .astype(jnp.bfloat16))
    bout_pad = jnp.full((1, NTAG_PAD), -1e30, jnp.float32).at[0, :NTAG].set(b_out)

    return (w_fused_pad, b_gate_pad, whh_pad, h0_pad, c0_pad, wout_pad, bout_pad)


if __name__ == "__main__":
    # Shapes implied by the module usage: vocab=10, emb=10, hidden=10,
    # n_tag=6, batch_size=3, seq padded to max length.
    V, E, H, NTAG = 10, 10, 10, 6
    B = 3
    x_lengths = jnp.array([8, 5, 3], dtype=jnp.int32)  # sorted (enforce_sorted)
    T = 8

    key = jax.random.PRNGKey(0)
    k_ids, k_params = jax.random.split(key)

    # Deterministic token ids; positions past each length are <PAD>=0.
    ids = jax.random.randint(k_ids, (B, T), 1, V, dtype=jnp.int32)
    pos = jnp.arange(T, dtype=jnp.int32)[None, :]
    ids = jnp.where(pos < x_lengths[:, None], ids, 0)

    params = init_params(k_params, V, E, H, NTAG, B, pad_idx=0)

    y_pred = my_lstm_forward(ids, x_lengths, params, NTAG)   # (B, T, NTAG)
    jax.block_until_ready(y_pred)

    assert y_pred.shape == (B, T, NTAG)
    assert bool(jnp.all(jnp.isfinite(y_pred)))
    # Positions at/after each sequence's length must be log_softmax(bias) only
    # (pad_packed_sequence zeros the hidden state there) -> finite; spot-check
    # that valid rows are proper log-probabilities.
    assert bool(jnp.allclose(jnp.sum(jnp.exp(y_pred), axis=-1), 1.0, atol=1e-3))
    print("KERNEL_OK")
</pallas_src>

<mosaic_0001>
module attributes {stable_mosaic.version = 11 : i64} {
  func.func @_lstm_kernel(%arg0: memref<8x8x512xf32, #tpu.memory_space<vmem>>, %arg1: memref<8x1xi32, #tpu.memory_space<vmem>>, %arg2: memref<128x512xbf16, #tpu.memory_space<vmem>>, %arg3: memref<8x128xf32, #tpu.memory_space<vmem>>, %arg4: memref<8x128xf32, #tpu.memory_space<vmem>>, %arg5: memref<128x128xbf16, #tpu.memory_space<vmem>>, %arg6: memref<1x128xf32, #tpu.memory_space<vmem>>, %arg7: memref<8x8x128xf32, #tpu.memory_space<vmem>>, %arg8: memref<8x8x128xf32, #tpu.memory_space<vmem>>) attributes {dimension_semantics = [], scalar_prefetch = 0 : i64, scratch_operands = 1 : i64, tpu.core_type = #tpu.core_type<tc>} {
    %c0 = arith.constant 0 : index
    %c0_0 = arith.constant 0 : index
    %0 = vector.load %arg2[%c0, %c0_0] : memref<128x512xbf16, #tpu.memory_space<vmem>>, vector<128x512xbf16>
    %c0_1 = arith.constant 0 : index
    %c0_2 = arith.constant 0 : index
    %1 = vector.load %arg1[%c0_1, %c0_2] : memref<8x1xi32, #tpu.memory_space<vmem>>, vector<8x1xi32>
    %c0_3 = arith.constant 0 : index
    %c0_4 = arith.constant 0 : index
    %2 = vector.load %arg3[%c0_3, %c0_4] : memref<8x128xf32, #tpu.memory_space<vmem>>, vector<8x128xf32>
    %c0_5 = arith.constant 0 : index
    %c0_6 = arith.constant 0 : index
    %3 = vector.load %arg4[%c0_5, %c0_6] : memref<8x128xf32, #tpu.memory_space<vmem>>, vector<8x128xf32>
    %c0_i32 = arith.constant 0 : i32
    %4 = arith.index_cast %c0_i32 : i32 to index
    %c0_7 = arith.constant 0 : index
    %c0_8 = arith.constant 0 : index
    %5 = vector.load %arg0[%4, %c0_7, %c0_8] : memref<8x8x512xf32, #tpu.memory_space<vmem>>, vector<1x8x512xf32>
    %6 = vector.shape_cast %5 : vector<1x8x512xf32> to vector<8x512xf32>
    %7 = arith.truncf %2 : vector<8x128xf32> to vector<8x128xbf16>
    %cst = arith.constant dense<0.000000e+00> : vector<8x512xf32>
    %8 = tpu.matmul %7, %0, %cst {dimension_numbers = #tpu.dot_dimension_numbers<[1], [0], [0], [1], [0, 0, 1, 1], [], []>} : vector<8x128xbf16>, vector<128x512xbf16>, vector<8x512xf32> -> vector<8x512xf32>
    %9 = arith.addf %6, %8 : vector<8x512xf32>
    %10 = vector.extract_strided_slice %9 {offsets = [0, 0], sizes = [8, 128], strides = [1, 1]} : vector<8x512xf32> to vector<8x128xf32>
    %11 = arith.negf %10 : vector<8x128xf32>
    %12 = math.exp %11 : vector<8x128xf32>
    %cst_9 = arith.constant 1.000000e+00 : f32
    %13 = vector.broadcast %cst_9 : f32 to vector<8x128xf32>
    %14 = arith.addf %13, %12 : vector<8x128xf32>
    %15 = arith.divf %13, %14 : vector<8x128xf32>
    %16 = vector.extract_strided_slice %9 {offsets = [0, 128], sizes = [8, 128], strides = [1, 1]} : vector<8x512xf32> to vector<8x128xf32>
    %17 = arith.negf %16 : vector<8x128xf32>
    %18 = math.exp %17 : vector<8x128xf32>
    %cst_10 = arith.constant 1.000000e+00 : f32
    %19 = vector.broadcast %cst_10 : f32 to vector<8x128xf32>
    %20 = arith.addf %19, %18 : vector<8x128xf32>
    %21 = arith.divf %19, %20 : vector<8x128xf32>
    %22 = vector.extract_strided_slice %9 {offsets = [0, 256], sizes = [8, 128], strides = [1, 1]} : vector<8x512xf32> to vector<8x128xf32>
    %23 = math.tanh %22 : vector<8x128xf32>
    %24 = vector.extract_strided_slice %9 {offsets = [0, 384], sizes = [8, 128], strides = [1, 1]} : vector<8x512xf32> to vector<8x128xf32>
    %25 = arith.negf %24 : vector<8x128xf32>
    %26 = math.exp %25 : vector<8x128xf32>
    %cst_11 = arith.constant 1.000000e+00 : f32
    %27 = vector.broadcast %cst_11 : f32 to vector<8x128xf32>
    %28 = arith.addf %27, %26 : vector<8x128xf32>
    %29 = arith.divf %27, %28 : vector<8x128xf32>
    %30 = arith.mulf %21, %3 : vector<8x128xf32>
    %31 = arith.mulf %15, %23 : vector<8x128xf32>
    %32 = arith.addf %30, %31 : vector<8x128xf32>
    %33 = math.tanh %32 : vector<8x128xf32>
    %34 = arith.mulf %29, %33 : vector<8x128xf32>
    %35 = vector.broadcast %c0_i32 : i32 to vector<8x1xi32>
    %36 = arith.cmpi slt, %35, %1 : vector<8x1xi32>
    %37 = arith.extui %36 : vector<8x1xi1> to vector<8x1xi32>
    %38 = arith.sitofp %37 : vector<8x1xi32> to vector<8x1xf32>
    %39 = arith.subf %34, %2 : vector<8x128xf32>
    %40 = vector.broadcast %38 : vector<8x1xf32> to vector<8x128xf32>
    %41 = arith.mulf %40, %39 : vector<8x128xf32>
    %42 = arith.addf %2, %41 : vector<8x128xf32>
    %43 = arith.subf %32, %3 : vector<8x128xf32>
    %44 = vector.broadcast %38 : vector<8x1xf32> to vector<8x128xf32>
    %45 = arith.mulf %44, %43 : vector<8x128xf32>
    %46 = arith.addf %3, %45 : vector<8x128xf32>
    %47 = vector.broadcast %38 : vector<8x1xf32> to vector<8x128xf32>
    %48 = arith.mulf %47, %42 : vector<8x128xf32>
    %49 = arith.index_cast %c0_i32 : i32 to index
    %c0_12 = arith.constant 0 : index
    %c0_13 = arith.constant 0 : index
    %50 = vector.load %arg8[%49, %c0_12, %c0_13] : memref<8x8x128xf32, #tpu.memory_space<vmem>>, vector<1x8x128xf32>
    %51 = vector.shape_cast %50 : vector<1x8x128xf32> to vector<8x128xf32>
    %52 = vector.shape_cast %48 : vector<8x128xf32> to vector<1x8x128xf32>
    tpu.vector_store %arg8[%49, %c0_12, %c0_13], %52 {strides = array<i32>} : memref<8x8x128xf32, #tpu.memory_space<vmem>>, vector<1x8x128xf32>,
    %c1_i32 = arith.constant 1 : i32
    %53 = arith.index_cast %c1_i32 : i32 to index
    %c0_14 = arith.constant 0 : index
    %c0_15 = arith.constant 0 : index
    %54 = vector.load %arg0[%53, %c0_14, %c0_15] : memref<8x8x512xf32, #tpu.memory_space<vmem>>, vector<1x8x512xf32>
    %55 = vector.shape_cast %54 : vector<1x8x512xf32> to vector<8x512xf32>
    %56 = arith.truncf %42 : vector<8x128xf32> to vector<8x128xbf16>
    %cst_16 = arith.constant dense<0.000000e+00> : vector<8x512xf32>
    %57 = tpu.matmul %56, %0, %cst_16 {dimension_numbers = #tpu.dot_dimension_numbers<[1], [0], [0], [1], [0, 0, 1, 1], [], []>} : vector<8x128xbf16>, vector<128x512xbf16>, vector<8x512xf32> -> vector<8x512xf32>
    %58 = arith.addf %55, %57 : vector<8x512xf32>
    %59 = vector.extract_strided_slice %58 {offsets = [0, 0], sizes = [8, 128], strides = [1, 1]} : vector<8x512xf32> to vector<8x128xf32>
    %60 = arith.negf %59 : vector<8x128xf32>
    %61 = math.exp %60 : vector<8x128xf32>
    %cst_17 = arith.constant 1.000000e+00 : f32
    %62 = vector.broadcast %cst_17 : f32 to vector<8x128xf32>
    %63 = arith.addf %62, %61 : vector<8x128xf32>
    %64 = arith.divf %62, %63 : vector<8x128xf32>
    %65 = vector.extract_strided_slice %58 {offsets = [0, 128], sizes = [8, 128], strides = [1, 1]} : vector<8x512xf32> to vector<8x128xf32>
    %66 = arith.negf %65 : vector<8x128xf32>
    %67 = math.exp %66 : vector<8x128xf32>
    %cst_18 = arith.constant 1.000000e+00 : f32
    %68 = vector.broadcast %cst_18 : f32 to vector<8x128xf32>
    %69 = arith.addf %68, %67 : vector<8x128xf32>
    %70 = arith.divf %68, %69 : vector<8x128xf32>
    %71 = vector.extract_strided_slice %58 {offsets = [0, 256], sizes = [8, 128], strides = [1, 1]} : vector<8x512xf32> to vector<8x128xf32>
    %72 = math.tanh %71 : vector<8x128xf32>
    %73 = vector.extract_strided_slice %58 {offsets = [0, 384], sizes = [8, 128], strides = [1, 1]} : vector<8x512xf32> to vector<8x128xf32>
    %74 = arith.negf %73 : vector<8x128xf32>
    %75 = math.exp %74 : vector<8x128xf32>
    %cst_19 = arith.constant 1.000000e+00 : f32
    %76 = vector.broadcast %cst_19 : f32 to vector<8x128xf32>
    %77 = arith.addf %76, %75 : vector<8x128xf32>
    %78 = arith.divf %76, %77 : vector<8x128xf32>
    %79 = arith.mulf %70, %46 : vector<8x128xf32>
    %80 = arith.mulf %64, %72 : vector<8x128xf32>
    %81 = arith.addf %79, %80 : vector<8x128xf32>
    %82 = math.tanh %81 : vector<8x128xf32>
    %83 = arith.mulf %78, %82 : vector<8x128xf32>
    %84 = vector.broadcast %c1_i32 : i32 to vector<8x1xi32>
    %85 = arith.cmpi slt, %84, %1 : vector<8x1xi32>
    %86 = arith.extui %85 : vector<8x1xi1> to vector<8x1xi32>
    %87 = arith.sitofp %86 : vector<8x1xi32> to vector<8x1xf32>
    %88 = arith.subf %83, %42 : vector<8x128xf32>
    %89 = vector.broadcast %87 : vector<8x1xf32> to vector<8x128xf32>
    %90 = arith.mulf %89, %88 : vector<8x128xf32>
    %91 = arith.addf %42, %90 : vector<8x128xf32>
    %92 = arith.subf %81, %46 : vector<8x128xf32>
    %93 = vector.broadcast %87 : vector<8x1xf32> to vector<8x128xf32>
    %94 = arith.mulf %93, %92 : vector<8x128xf32>
    %95 = arith.addf %46, %94 : vector<8x128xf32>
    %96 = vector.broadcast %87 : vector<8x1xf32> to vector<8x128xf32>
    %97 = arith.mulf %96, %91 : vector<8x128xf32>
    %98 = arith.index_cast %c1_i32 : i32 to index
    %c0_20 = arith.constant 0 : index
    %c0_21 = arith.constant 0 : index
    %99 = vector.load %arg8[%98, %c0_20, %c0_21] : memref<8x8x128xf32, #tpu.memory_space<vmem>>, vector<1x8x128xf32>
    %100 = vector.shape_cast %99 : vector<1x8x128xf32> to vector<8x128xf32>
    %101 = vector.shape_cast %97 : vector<8x128xf32> to vector<1x8x128xf32>
    tpu.vector_store %arg8[%98, %c0_20, %c0_21], %101 {strides = array<i32>} : memref<8x8x128xf32, #tpu.memory_space<vmem>>, vector<1x8x128xf32>,
    %c2_i32 = arith.constant 2 : i32
    %102 = arith.index_cast %c2_i32 : i32 to index
    %c0_22 = arith.constant 0 : index
    %c0_23 = arith.constant 0 : index
    %103 = vector.load %arg0[%102, %c0_22, %c0_23] : memref<8x8x512xf32, #tpu.memory_space<vmem>>, vector<1x8x512xf32>
    %104 = vector.shape_cast %103 : vector<1x8x512xf32> to vector<8x512xf32>
    %105 = arith.truncf %91 : vector<8x128xf32> to vector<8x128xbf16>
    %cst_24 = arith.constant dense<0.000000e+00> : vector<8x512xf32>
    %106 = tpu.matmul %105, %0, %cst_24 {dimension_numbers = #tpu.dot_dimension_numbers<[1], [0], [0], [1], [0, 0, 1, 1], [], []>} : vector<8x128xbf16>, vector<128x512xbf16>, vector<8x512xf32> -> vector<8x512xf32>
    %107 = arith.addf %104, %106 : vector<8x512xf32>
    %108 = vector.extract_strided_slice %107 {offsets = [0, 0], sizes = [8, 128], strides = [1, 1]} : vector<8x512xf32> to vector<8x128xf32>
    %109 = arith.negf %108 : vector<8x128xf32>
    %110 = math.exp %109 : vector<8x128xf32>
    %cst_25 = arith.constant 1.000000e+00 : f32
    %111 = vector.broadcast %cst_25 : f32 to vector<8x128xf32>
    %112 = arith.addf %111, %110 : vector<8x128xf32>
    %113 = arith.divf %111, %112 : vector<8x128xf32>
    %114 = vector.extract_strided_slice %107 {offsets = [0, 128], sizes = [8, 128], strides = [1, 1]} : vector<8x512xf32> to vector<8x128xf32>
    %115 = arith.negf %114 : vector<8x128xf32>
    %116 = math.exp %115 : vector<8x128xf32>
    %cst_26 = arith.constant 1.000000e+00 : f32
    %117 = vector.broadcast %cst_26 : f32 to vector<8x128xf32>
    %118 = arith.addf %117, %116 : vector<8x128xf32>
    %119 = arith.divf %117, %118 : vector<8x128xf32>
    %120 = vector.extract_strided_slice %107 {offsets = [0, 256], sizes = [8, 128], strides = [1, 1]} : vector<8x512xf32> to vector<8x128xf32>
    %121 = math.tanh %120 : vector<8x128xf32>
    %122 = vector.extract_strided_slice %107 {offsets = [0, 384], sizes = [8, 128], strides = [1, 1]} : vector<8x512xf32> to vector<8x128xf32>
    %123 = arith.negf %122 : vector<8x128xf32>
    %124 = math.exp %123 : vector<8x128xf32>
    %cst_27 = arith.constant 1.000000e+00 : f32
    %125 = vector.broadcast %cst_27 : f32 to vector<8x128xf32>
    %126 = arith.addf %125, %124 : vector<8x128xf32>
    %127 = arith.divf %125, %126 : vector<8x128xf32>
    %128 = arith.mulf %119, %95 : vector<8x128xf32>
    %129 = arith.mulf %113, %121 : vector<8x128xf32>
    %130 = arith.addf %128, %129 : vector<8x128xf32>
    %131 = math.tanh %130 : vector<8x128xf32>
    %132 = arith.mulf %127, %131 : vector<8x128xf32>
    %133 = vector.broadcast %c2_i32 : i32 to vector<8x1xi32>
    %134 = arith.cmpi slt, %133, %1 : vector<8x1xi32>
    %135 = arith.extui %134 : vector<8x1xi1> to vector<8x1xi32>
    %136 = arith.sitofp %135 : vector<8x1xi32> to vector<8x1xf32>
    %137 = arith.subf %132, %91 : vector<8x128xf32>
    %138 = vector.broadcast %136 : vector<8x1xf32> to vector<8x128xf32>
    %139 = arith.mulf %138, %137 : vector<8x128xf32>
    %140 = arith.addf %91, %139 : vector<8x128xf32>
    %141 = arith.subf %130, %95 : vector<8x128xf32>
    %142 = vector.broadcast %136 : vector<8x1xf32> to vector<8x128xf32>
    %143 = arith.mulf %142, %141 : vector<8x128xf32>
    %144 = arith.addf %95, %143 : vector<8x128xf32>
    %145 = vector.broadcast %136 : vector<8x1xf32> to vector<8x128xf32>
    %146 = arith.mulf %145, %140 : vector<8x128xf32>
    %147 = arith.index_cast %c2_i32 : i32 to index
    %c0_28 = arith.constant 0 : index
    %c0_29 = arith.constant 0 : index
    %148 = vector.load %arg8[%147, %c0_28, %c0_29] : memref<8x8x128xf32, #tpu.memory_space<vmem>>, vector<1x8x128xf32>
    %149 = vector.shape_cast %148 : vector<1x8x128xf32> to vector<8x128xf32>
    %150 = vector.shape_cast %146 : vector<8x128xf32> to vector<1x8x128xf32>
    tpu.vector_store %arg8[%147, %c0_28, %c0_29], %150 {strides = array<i32>} : memref<8x8x128xf32, #tpu.memory_space<vmem>>, vector<1x8x128xf32>,
    %c3_i32 = arith.constant 3 : i32
    %151 = arith.index_cast %c3_i32 : i32 to index
    %c0_30 = arith.constant 0 : index
    %c0_31 = arith.constant 0 : index
    %152 = vector.load %arg0[%151, %c0_30, %c0_31] : memref<8x8x512xf32, #tpu.memory_space<vmem>>, vector<1x8x512xf32>
    %153 = vector.shape_cast %152 : vector<1x8x512xf32> to vector<8x512xf32>
    %154 = arith.truncf %140 : vector<8x128xf32> to vector<8x128xbf16>
    %cst_32 = arith.constant dense<0.000000e+00> : vector<8x512xf32>
    %155 = tpu.matmul %154, %0, %cst_32 {dimension_numbers = #tpu.dot_dimension_numbers<[1], [0], [0], [1], [0, 0, 1, 1], [], []>} : vector<8x128xbf16>, vector<128x512xbf16>, vector<8x512xf32> -> vector<8x512xf32>
    %156 = arith.addf %153, %155 : vector<8x512xf32>
    %157 = vector.extract_strided_slice %156 {offsets = [0, 0], sizes = [8, 128], strides = [1, 1]} : vector<8x512xf32> to vector<8x128xf32>
    %158 = arith.negf %157 : vector<8x128xf32>
    %159 = math.exp %158 : vector<8x128xf32>
    %cst_33 = arith.constant 1.000000e+00 : f32
    %160 = vector.broadcast %cst_33 : f32 to vector<8x128xf32>
    %161 = arith.addf %160, %159 : vector<8x128xf32>
    %162 = arith.divf %160, %161 : vector<8x128xf32>
    %163 = vector.extract_strided_slice %156 {offsets = [0, 128], sizes = [8, 128], strides = [1, 1]} : vector<8x512xf32> to vector<8x128xf32>
    %164 = arith.negf %163 : vector<8x128xf32>
    %165 = math.exp %164 : vector<8x128xf32>
    %cst_34 = arith.constant 1.000000e+00 : f32
    %166 = vector.broadcast %cst_34 : f32 to vector<8x128xf32>
    %167 = arith.addf %166, %165 : vector<8x128xf32>
    %168 = arith.divf %166, %167 : vector<8x128xf32>
    %169 = vector.extract_strided_slice %156 {offsets = [0, 256], sizes = [8, 128], strides = [1, 1]} : vector<8x512xf32> to vector<8x128xf32>
    %170 = math.tanh %169 : vector<8x128xf32>
    %171 = vector.extract_strided_slice %156 {offsets = [0, 384], sizes = [8, 128], strides = [1, 1]} : vector<8x512xf32> to vector<8x128xf32>
    %172 = arith.negf %171 : vector<8x128xf32>
    %173 = math.exp %172 : vector<8x128xf32>
    %cst_35 = arith.constant 1.000000e+00 : f32
    %174 = vector.broadcast %cst_35 : f32 to vector<8x128xf32>
    %175 = arith.addf %174, %173 : vector<8x128xf32>
    %176 = arith.divf %174, %175 : vector<8x128xf32>
    %177 = arith.mulf %168, %144 : vector<8x128xf32>
    %178 = arith.mulf %162, %170 : vector<8x128xf32>
    %179 = arith.addf %177, %178 : vector<8x128xf32>
    %180 = math.tanh %179 : vector<8x128xf32>
    %181 = arith.mulf %176, %180 : vector<8x128xf32>
    %182 = vector.broadcast %c3_i32 : i32 to vector<8x1xi32>
    %183 = arith.cmpi slt, %182, %1 : vector<8x1xi32>
    %184 = arith.extui %183 : vector<8x1xi1> to vector<8x1xi32>
    %185 = arith.sitofp %184 : vector<8x1xi32> to vector<8x1xf32>
    %186 = arith.subf %181, %140 : vector<8x128xf32>
    %187 = vector.broadcast %185 : vector<8x1xf32> to vector<8x128xf32>
    %188 = arith.mulf %187, %186 : vector<8x128xf32>
    %189 = arith.addf %140, %188 : vector<8x128xf32>
    %190 = arith.subf %179, %144 : vector<8x128xf32>
    %191 = vector.broadcast %185 : vector<8x1xf32> to vector<8x128xf32>
    %192 = arith.mulf %191, %190 : vector<8x128xf32>
    %193 = arith.addf %144, %192 : vector<8x128xf32>
    %194 = vector.broadcast %185 : vector<8x1xf32> to vector<8x128xf32>
    %195 = arith.mulf %194, %189 : vector<8x128xf32>
    %196 = arith.index_cast %c3_i32 : i32 to index
    %c0_36 = arith.constant 0 : index
    %c0_37 = arith.constant 0 : index
    %197 = vector.load %arg8[%196, %c0_36, %c0_37] : memref<8x8x128xf32, #tpu.memory_space<vmem>>, vector<1x8x128xf32>
    %198 = vector.shape_cast %197 : vector<1x8x128xf32> to vector<8x128xf32>
    %199 = vector.shape_cast %195 : vector<8x128xf32> to vector<1x8x128xf32>
    tpu.vector_store %arg8[%196, %c0_36, %c0_37], %199 {strides = array<i32>} : memref<8x8x128xf32, #tpu.memory_space<vmem>>, vector<1x8x128xf32>,
    %c4_i32 = arith.constant 4 : i32
    %200 = arith.index_cast %c4_i32 : i32 to index
    %c0_38 = arith.constant 0 : index
    %c0_39 = arith.constant 0 : index
    %201 = vector.load %arg0[%200, %c0_38, %c0_39] : memref<8x8x512xf32, #tpu.memory_space<vmem>>, vector<1x8x512xf32>
    %202 = vector.shape_cast %201 : vector<1x8x512xf32> to vector<8x512xf32>
    %203 = arith.truncf %189 : vector<8x128xf32> to vector<8x128xbf16>
    %cst_40 = arith.constant dense<0.000000e+00> : vector<8x512xf32>
    %204 = tpu.matmul %203, %0, %cst_40 {dimension_numbers = #tpu.dot_dimension_numbers<[1], [0], [0], [1], [0, 0, 1, 1], [], []>} : vector<8x128xbf16>, vector<128x512xbf16>, vector<8x512xf32> -> vector<8x512xf32>
    %205 = arith.addf %202, %204 : vector<8x512xf32>
    %206 = vector.extract_strided_slice %205 {offsets = [0, 0], sizes = [8, 128], strides = [1, 1]} : vector<8x512xf32> to vector<8x128xf32>
    %207 = arith.negf %206 : vector<8x128xf32>
    %208 = math.exp %207 : vector<8x128xf32>
    %cst_41 = arith.constant 1.000000e+00 : f32
    %209 = vector.broadcast %cst_41 : f32 to vector<8x128xf32>
    %210 = arith.addf %209, %208 : vector<8x128xf32>
    %211 = arith.divf %209, %210 : vector<8x128xf32>
    %212 = vector.extract_strided_slice %205 {offsets = [0, 128], sizes = [8, 128], strides = [1, 1]} : vector<8x512xf32> to vector<8x128xf32>
    %213 = arith.negf %212 : vector<8x128xf32>
    %214 = math.exp %213 : vector<8x128xf32>
    %cst_42 = arith.constant 1.000000e+00 : f32
    %215 = vector.broadcast %cst_42 : f32 to vector<8x128xf32>
    %216 = arith.addf %215, %214 : vector<8x128xf32>
    %217 = arith.divf %215, %216 : vector<8x128xf32>
    %218 = vector.extract_strided_slice %205 {offsets = [0, 256], sizes = [8, 128], strides = [1, 1]} : vector<8x512xf32> to vector<8x128xf32>
    %219 = math.tanh %218 : vector<8x128xf32>
    %220 = vector.extract_strided_slice %205 {offsets = [0, 384], sizes = [8, 128], strides = [1, 1]} : vector<8x512xf32> to vector<8x128xf32>
    %221 = arith.negf %220 : vector<8x128xf32>
    %222 = math.exp %221 : vector<8x128xf32>
    %cst_43 = arith.constant 1.000000e+00 : f32
    %223 = vector.broadcast %cst_43 : f32 to vector<8x128xf32>
    %224 = arith.addf %223, %222 : vector<8x128xf32>
    %225 = arith.divf %223, %224 : vector<8x128xf32>
    %226 = arith.mulf %217, %193 : vector<8x128xf32>
    %227 = arith.mulf %211, %219 : vector<8x128xf32>
    %228 = arith.addf %226, %227 : vector<8x128xf32>
    %229 = math.tanh %228 : vector<8x128xf32>
    %230 = arith.mulf %225, %229 : vector<8x128xf32>
    %231 = vector.broadcast %c4_i32 : i32 to vector<8x1xi32>
    %232 = arith.cmpi slt, %231, %1 : vector<8x1xi32>
    %233 = arith.extui %232 : vector<8x1xi1> to vector<8x1xi32>
    %234 = arith.sitofp %233 : vector<8x1xi32> to vector<8x1xf32>
    %235 = arith.subf %230, %189 : vector<8x128xf32>
    %236 = vector.broadcast %234 : vector<8x1xf32> to vector<8x128xf32>
    %237 = arith.mulf %236, %235 : vector<8x128xf32>
    %238 = arith.addf %189, %237 : vector<8x128xf32>
    %239 = arith.subf %228, %193 : vector<8x128xf32>
    %240 = vector.broadcast %234 : vector<8x1xf32> to vector<8x128xf32>
    %241 = arith.mulf %240, %239 : vector<8x128xf32>
    %242 = arith.addf %193, %241 : vector<8x128xf32>
    %243 = vector.broadcast %234 : vector<8x1xf32> to vector<8x128xf32>
    %244 = arith.mulf %243, %238 : vector<8x128xf32>
    %245 = arith.index_cast %c4_i32 : i32 to index
    %c0_44 = arith.constant 0 : index
    %c0_45 = arith.constant 0 : index
    %246 = vector.load %arg8[%245, %c0_44, %c0_45] : memref<8x8x128xf32, #tpu.memory_space<vmem>>, vector<1x8x128xf32>
    %247 = vector.shape_cast %246 : vector<1x8x128xf32> to vector<8x128xf32>
    %248 = vector.shape_cast %244 : vector<8x128xf32> to vector<1x8x128xf32>
    tpu.vector_store %arg8[%245, %c0_44, %c0_45], %248 {strides = array<i32>} : memref<8x8x128xf32, #tpu.memory_space<vmem>>, vector<1x8x128xf32>,
    %c5_i32 = arith.constant 5 : i32
    %249 = arith.index_cast %c5_i32 : i32 to index
    %c0_46 = arith.constant 0 : index
    %c0_47 = arith.constant 0 : index
    %250 = vector.load %arg0[%249, %c0_46, %c0_47] : memref<8x8x512xf32, #tpu.memory_space<vmem>>, vector<1x8x512xf32>
    %251 = vector.shape_cast %250 : vector<1x8x512xf32> to vector<8x512xf32>
    %252 = arith.truncf %238 : vector<8x128xf32> to vector<8x128xbf16>
    %cst_48 = arith.constant dense<0.000000e+00> : vector<8x512xf32>
    %253 = tpu.matmul %252, %0, %cst_48 {dimension_numbers = #tpu.dot_dimension_numbers<[1], [0], [0], [1], [0, 0, 1, 1], [], []>} : vector<8x128xbf16>, vector<128x512xbf16>, vector<8x512xf32> -> vector<8x512xf32>
    %254 = arith.addf %251, %253 : vector<8x512xf32>
    %255 = vector.extract_strided_slice %254 {offsets = [0, 0], sizes = [8, 128], strides = [1, 1]} : vector<8x512xf32> to vector<8x128xf32>
    %256 = arith.negf %255 : vector<8x128xf32>
    %257 = math.exp %256 : vector<8x128xf32>
    %cst_49 = arith.constant 1.000000e+00 : f32
    %258 = vector.broadcast %cst_49 : f32 to vector<8x128xf32>
    %259 = arith.addf %258, %257 : vector<8x128xf32>
    %260 = arith.divf %258, %259 : vector<8x128xf32>
    %261 = vector.extract_strided_slice %254 {offsets = [0, 128], sizes = [8, 128], strides = [1, 1]} : vector<8x512xf32> to vector<8x128xf32>
    %262 = arith.negf %261 : vector<8x128xf32>
    %263 = math.exp %262 : vector<8x128xf32>
    %cst_50 = arith.constant 1.000000e+00 : f32
    %264 = vector.broadcast %cst_50 : f32 to vector<8x128xf32>
    %265 = arith.addf %264, %263 : vector<8x128xf32>
    %266 = arith.divf %264, %265 : vector<8x128xf32>
    %267 = vector.extract_strided_slice %254 {offsets = [0, 256], sizes = [8, 128], strides = [1, 1]} : vector<8x512xf32> to vector<8x128xf32>
    %268 = math.tanh %267 : vector<8x128xf32>
    %269 = vector.extract_strided_slice %254 {offsets = [0, 384], sizes = [8, 128], strides = [1, 1]} : vector<8x512xf32> to vector<8x128xf32>
    %270 = arith.negf %269 : vector<8x128xf32>
    %271 = math.exp %270 : vector<8x128xf32>
    %cst_51 = arith.constant 1.000000e+00 : f32
    %272 = vector.broadcast %cst_51 : f32 to vector<8x128xf32>
    %273 = arith.addf %272, %271 : vector<8x128xf32>
    %274 = arith.divf %272, %273 : vector<8x128xf32>
    %275 = arith.mulf %266, %242 : vector<8x128xf32>
    %276 = arith.mulf %260, %268 : vector<8x128xf32>
    %277 = arith.addf %275, %276 : vector<8x128xf32>
    %278 = math.tanh %277 : vector<8x128xf32>
    %279 = arith.mulf %274, %278 : vector<8x128xf32>
    %280 = vector.broadcast %c5_i32 : i32 to vector<8x1xi32>
    %281 = arith.cmpi slt, %280, %1 : vector<8x1xi32>
    %282 = arith.extui %281 : vector<8x1xi1> to vector<8x1xi32>
    %283 = arith.sitofp %282 : vector<8x1xi32> to vector<8x1xf32>
    %284 = arith.subf %279, %238 : vector<8x128xf32>
    %285 = vector.broadcast %283 : vector<8x1xf32> to vector<8x128xf32>
    %286 = arith.mulf %285, %284 : vector<8x128xf32>
    %287 = arith.addf %238, %286 : vector<8x128xf32>
    %288 = arith.subf %277, %242 : vector<8x128xf32>
    %289 = vector.broadcast %283 : vector<8x1xf32> to vector<8x128xf32>
    %290 = arith.mulf %289, %288 : vector<8x128xf32>
    %291 = arith.addf %242, %290 : vector<8x128xf32>
    %292 = vector.broadcast %283 : vector<8x1xf32> to vector<8x128xf32>
    %293 = arith.mulf %292, %287 : vector<8x128xf32>
    %294 = arith.index_cast %c5_i32 : i32 to index
    %c0_52 = arith.constant 0 : index
    %c0_53 = arith.constant 0 : index
    %295 = vector.load %arg8[%294, %c0_52, %c0_53] : memref<8x8x128xf32, #tpu.memory_space<vmem>>, vector<1x8x128xf32>
    %296 = vector.shape_cast %295 : vector<1x8x128xf32> to vector<8x128xf32>
    %297 = vector.shape_cast %293 : vector<8x128xf32> to vector<1x8x128xf32>
    tpu.vector_store %arg8[%294, %c0_52, %c0_53], %297 {strides = array<i32>} : memref<8x8x128xf32, #tpu.memory_space<vmem>>, vector<1x8x128xf32>,
    %c6_i32 = arith.constant 6 : i32
    %298 = arith.index_cast %c6_i32 : i32 to index
    %c0_54 = arith.constant 0 : index
    %c0_55 = arith.constant 0 : index
    %299 = vector.load %arg0[%298, %c0_54, %c0_55] : memref<8x8x512xf32, #tpu.memory_space<vmem>>, vector<1x8x512xf32>
    %300 = vector.shape_cast %299 : vector<1x8x512xf32> to vector<8x512xf32>
    %301 = arith.truncf %287 : vector<8x128xf32> to vector<8x128xbf16>
    %cst_56 = arith.constant dense<0.000000e+00> : vector<8x512xf32>
    %302 = tpu.matmul %301, %0, %cst_56 {dimension_numbers = #tpu.dot_dimension_numbers<[1], [0], [0], [1], [0, 0, 1, 1], [], []>} : vector<8x128xbf16>, vector<128x512xbf16>, vector<8x512xf32> -> vector<8x512xf32>
    %303 = arith.addf %300, %302 : vector<8x512xf32>
    %304 = vector.extract_strided_slice %303 {offsets = [0, 0], sizes = [8, 128], strides = [1, 1]} : vector<8x512xf32> to vector<8x128xf32>
    %305 = arith.negf %304 : vector<8x128xf32>
    %306 = math.exp %305 : vector<8x128xf32>
    %cst_57 = arith.constant 1.000000e+00 : f32
    %307 = vector.broadcast %cst_57 : f32 to vector<8x128xf32>
    %308 = arith.addf %307, %306 : vector<8x128xf32>
    %309 = arith.divf %307, %308 : vector<8x128xf32>
    %310 = vector.extract_strided_slice %303 {offsets = [0, 128], sizes = [8, 128], strides = [1, 1]} : vector<8x512xf32> to vector<8x128xf32>
    %311 = arith.negf %310 : vector<8x128xf32>
    %312 = math.exp %311 : vector<8x128xf32>
    %cst_58 = arith.constant 1.000000e+00 : f32
    %313 = vector.broadcast %cst_58 : f32 to vector<8x128xf32>
    %314 = arith.addf %313, %312 : vector<8x128xf32>
    %315 = arith.divf %313, %314 : vector<8x128xf32>
    %316 = vector.extract_strided_slice %303 {offsets = [0, 256], sizes = [8, 128], strides = [1, 1]} : vector<8x512xf32> to vector<8x128xf32>
    %317 = math.tanh %316 : vector<8x128xf32>
    %318 = vector.extract_strided_slice %303 {offsets = [0, 384], sizes = [8, 128], strides = [1, 1]} : vector<8x512xf32> to vector<8x128xf32>
    %319 = arith.negf %318 : vector<8x128xf32>
    %320 = math.exp %319 : vector<8x128xf32>
    %cst_59 = arith.constant 1.000000e+00 : f32
    %321 = vector.broadcast %cst_59 : f32 to vector<8x128xf32>
    %322 = arith.addf %321, %320 : vector<8x128xf32>
    %323 = arith.divf %321, %322 : vector<8x128xf32>
    %324 = arith.mulf %315, %291 : vector<8x128xf32>
    %325 = arith.mulf %309, %317 : vector<8x128xf32>
    %326 = arith.addf %324, %325 : vector<8x128xf32>
    %327 = math.tanh %326 : vector<8x128xf32>
    %328 = arith.mulf %323, %327 : vector<8x128xf32>
    %329 = vector.broadcast %c6_i32 : i32 to vector<8x1xi32>
    %330 = arith.cmpi slt, %329, %1 : vector<8x1xi32>
    %331 = arith.extui %330 : vector<8x1xi1> to vector<8x1xi32>
    %332 = arith.sitofp %331 : vector<8x1xi32> to vector<8x1xf32>
    %333 = arith.subf %328, %287 : vector<8x128xf32>
    %334 = vector.broadcast %332 : vector<8x1xf32> to vector<8x128xf32>
    %335 = arith.mulf %334, %333 : vector<8x128xf32>
    %336 = arith.addf %287, %335 : vector<8x128xf32>
    %337 = arith.subf %326, %291 : vector<8x128xf32>
    %338 = vector.broadcast %332 : vector<8x1xf32> to vector<8x128xf32>
    %339 = arith.mulf %338, %337 : vector<8x128xf32>
    %340 = arith.addf %291, %339 : vector<8x128xf32>
    %341 = vector.broadcast %332 : vector<8x1xf32> to vector<8x128xf32>
    %342 = arith.mulf %341, %336 : vector<8x128xf32>
    %343 = arith.index_cast %c6_i32 : i32 to index
    %c0_60 = arith.constant 0 : index
    %c0_61 = arith.constant 0 : index
    %344 = vector.load %arg8[%343, %c0_60, %c0_61] : memref<8x8x128xf32, #tpu.memory_space<vmem>>, vector<1x8x128xf32>
    %345 = vector.shape_cast %344 : vector<1x8x128xf32> to vector<8x128xf32>
    %346 = vector.shape_cast %342 : vector<8x128xf32> to vector<1x8x128xf32>
    tpu.vector_store %arg8[%343, %c0_60, %c0_61], %346 {strides = array<i32>} : memref<8x8x128xf32, #tpu.memory_space<vmem>>, vector<1x8x128xf32>,
    %c7_i32 = arith.constant 7 : i32
    %347 = arith.index_cast %c7_i32 : i32 to index
    %c0_62 = arith.constant 0 : index
    %c0_63 = arith.constant 0 : index
    %348 = vector.load %arg0[%347, %c0_62, %c0_63] : memref<8x8x512xf32, #tpu.memory_space<vmem>>, vector<1x8x512xf32>
    %349 = vector.shape_cast %348 : vector<1x8x512xf32> to vector<8x512xf32>
    %350 = arith.truncf %336 : vector<8x128xf32> to vector<8x128xbf16>
    %cst_64 = arith.constant dense<0.000000e+00> : vector<8x512xf32>
    %351 = tpu.matmul %350, %0, %cst_64 {dimension_numbers = #tpu.dot_dimension_numbers<[1], [0], [0], [1], [0, 0, 1, 1], [], []>} : vector<8x128xbf16>, vector<128x512xbf16>, vector<8x512xf32> -> vector<8x512xf32>
    %352 = arith.addf %349, %351 : vector<8x512xf32>
    %353 = vector.extract_strided_slice %352 {offsets = [0, 0], sizes = [8, 128], strides = [1, 1]} : vector<8x512xf32> to vector<8x128xf32>
    %354 = arith.negf %353 : vector<8x128xf32>
    %355 = math.exp %354 : vector<8x128xf32>
    %cst_65 = arith.constant 1.000000e+00 : f32
    %356 = vector.broadcast %cst_65 : f32 to vector<8x128xf32>
    %357 = arith.addf %356, %355 : vector<8x128xf32>
    %358 = arith.divf %356, %357 : vector<8x128xf32>
    %359 = vector.extract_strided_slice %352 {offsets = [0, 128], sizes = [8, 128], strides = [1, 1]} : vector<8x512xf32> to vector<8x128xf32>
    %360 = arith.negf %359 : vector<8x128xf32>
    %361 = math.exp %360 : vector<8x128xf32>
    %cst_66 = arith.constant 1.000000e+00 : f32
    %362 = vector.broadcast %cst_66 : f32 to vector<8x128xf32>
    %363 = arith.addf %362, %361 : vector<8x128xf32>
    %364 = arith.divf %362, %363 : vector<8x128xf32>
    %365 = vector.extract_strided_slice %352 {offsets = [0, 256], sizes = [8, 128], strides = [1, 1]} : vector<8x512xf32> to vector<8x128xf32>
    %366 = math.tanh %365 : vector<8x128xf32>
    %367 = vector.extract_strided_slice %352 {offsets = [0, 384], sizes = [8, 128], strides = [1, 1]} : vector<8x512xf32> to vector<8x128xf32>
    %368 = arith.negf %367 : vector<8x128xf32>
    %369 = math.exp %368 : vector<8x128xf32>
    %cst_67 = arith.constant 1.000000e+00 : f32
    %370 = vector.broadcast %cst_67 : f32 to vector<8x128xf32>
    %371 = arith.addf %370, %369 : vector<8x128xf32>
    %372 = arith.divf %370, %371 : vector<8x128xf32>
    %373 = arith.mulf %364, %340 : vector<8x128xf32>
    %374 = arith.mulf %358, %366 : vector<8x128xf32>
    %375 = arith.addf %373, %374 : vector<8x128xf32>
    %376 = math.tanh %375 : vector<8x128xf32>
    %377 = arith.mulf %372, %376 : vector<8x128xf32>
    %378 = vector.broadcast %c7_i32 : i32 to vector<8x1xi32>
    %379 = arith.cmpi slt, %378, %1 : vector<8x1xi32>
    %380 = arith.extui %379 : vector<8x1xi1> to vector<8x1xi32>
    %381 = arith.sitofp %380 : vector<8x1xi32> to vector<8x1xf32>
    %382 = arith.subf %377, %336 : vector<8x128xf32>
    %383 = vector.broadcast %381 : vector<8x1xf32> to vector<8x128xf32>
    %384 = arith.mulf %383, %382 : vector<8x128xf32>
    %385 = arith.addf %336, %384 : vector<8x128xf32>
    %386 = arith.subf %375, %340 : vector<8x128xf32>
    %387 = vector.broadcast %381 : vector<8x1xf32> to vector<8x128xf32>
    %388 = arith.mulf %387, %386 : vector<8x128xf32>
    %389 = arith.addf %340, %388 : vector<8x128xf32>
    %390 = vector.broadcast %381 : vector<8x1xf32> to vector<8x128xf32>
    %391 = arith.mulf %390, %385 : vector<8x128xf32>
    %392 = arith.index_cast %c7_i32 : i32 to index
    %c0_68 = arith.constant 0 : index
    %c0_69 = arith.constant 0 : index
    %393 = vector.load %arg8[%392, %c0_68, %c0_69] : memref<8x8x128xf32, #tpu.memory_space<vmem>>, vector<1x8x128xf32>
    %394 = vector.shape_cast %393 : vector<1x8x128xf32> to vector<8x128xf32>
    %395 = vector.shape_cast %391 : vector<8x128xf32> to vector<1x8x128xf32>
    tpu.vector_store %arg8[%392, %c0_68, %c0_69], %395 {strides = array<i32>} : memref<8x8x128xf32, #tpu.memory_space<vmem>>, vector<1x8x128xf32>,
    %c8_i32 = arith.constant 8 : i32
    %c0_70 = arith.constant 0 : index
    %c0_71 = arith.constant 0 : index
    %c0_72 = arith.constant 0 : index
    %396 = vector.load %arg8[%c0_70, %c0_71, %c0_72] : memref<8x8x128xf32, #tpu.memory_space<vmem>>, vector<8x8x128xf32>
    %397 = vector.shape_cast %396 : vector<8x8x128xf32> to vector<64x128xf32>
    %398 = arith.truncf %397 : vector<64x128xf32> to vector<64x128xbf16>
    %c0_73 = arith.constant 0 : index
    %c0_74 = arith.constant 0 : index
    %399 = vector.load %arg5[%c0_73, %c0_74] : memref<128x128xbf16, #tpu.memory_space<vmem>>, vector<128x128xbf16>
    %cst_75 = arith.constant dense<0.000000e+00> : vector<64x128xf32>
    %400 = tpu.matmul %398, %399, %cst_75 {dimension_numbers = #tpu.dot_dimension_numbers<[1], [0], [0], [1], [0, 0, 1, 1], [], []>} : vector<64x128xbf16>, vector<128x128xbf16>, vector<64x128xf32> -> vector<64x128xf32>
    %c0_76 = arith.constant 0 : index
    %c0_77 = arith.constant 0 : index
    %401 = vector.load %arg6[%c0_76, %c0_77] : memref<1x128xf32, #tpu.memory_space<vmem>>, vector<1x128xf32>
    %402 = vector.broadcast %401 : vector<1x128xf32> to vector<64x128xf32>
    %403 = arith.addf %400, %402 : vector<64x128xf32>
    %cst_78 = arith.constant dense<0xFF800000> : vector<64xf32>
    %404 = vector.multi_reduction <maximumf>, %403, %cst_78 [1] : vector<64x128xf32> to vector<64xf32>
    %405 = vector.shape_cast %404 : vector<64xf32> to vector<64x1xf32>
    %406 = vector.broadcast %405 : vector<64x1xf32> to vector<64x128xf32>
    %407 = arith.subf %403, %406 : vector<64x128xf32>
    %408 = math.exp %407 : vector<64x128xf32>
    %cst_79 = arith.constant dense<0.000000e+00> : vector<64xf32>
    %409 = vector.multi_reduction <add>, %408, %cst_79 [1] : vector<64x128xf32> to vector<64xf32>
    %410 = vector.shape_cast %409 : vector<64xf32> to vector<64x1xf32>
    %411 = math.log %410 : vector<64x1xf32>
    %412 = arith.addf %411, %405 : vector<64x1xf32>
    %413 = vector.broadcast %412 : vector<64x1xf32> to vector<64x128xf32>
    %414 = arith.subf %403, %413 : vector<64x128xf32>
    %415 = vector.shape_cast %414 : vector<64x128xf32> to vector<8x8x128xf32>
    %c0_80 = arith.constant 0 : index
    %c0_81 = arith.constant 0 : index
    %c0_82 = arith.constant 0 : index
    %416 = vector.load %arg7[%c0_80, %c0_81, %c0_82] : memref<8x8x128xf32, #tpu.memory_space<vmem>>, vector<8x8x128xf32>
    tpu.vector_store %arg7[%c0_80, %c0_81, %c0_82], %415 {strides = array<i32>} : memref<8x8x128xf32, #tpu.memory_space<vmem>>, vector<8x8x128xf32>,
    return
  }
}

</mosaic_0001>

<bundles_post_ra>
// kernel: tpu_custom_call.1
= control target key start
LH: loop header
LB: loop body
LE: loop exit
PB: predicated region body
PF: predicated region fallthrough
CT: control target
= control target key end

     0   :  { %12 = vsyncpa [#allocation4], 0  ;;  %s2685_s0 = inlined_call_operand.hbm [shape: f32[8,8,512], index: 0, kind: input, shape index: {}]   ;;  %s2686_s1 = inlined_call_operand.vmem [shape: s32[8,1], index: 1, kind: input, shape index: {}]   ;;  %s2687_s2 = inlined_call_operand.hbm [shape: bf16[128,512], index: 2, kind: input, shape index: {}]   ;;  %s2688_s3 = inlined_call_operand.vmem [shape: f32[8,128], index: 3, kind: input, shape index: {}]   ;;  %s2689_s4 = inlined_call_operand.vmem [shape: f32[8,128], index: 4, kind: input, shape index: {}]   ;;  %s2690_s5 = inlined_call_operand.hbm [shape: bf16[128,128], index: 5, kind: input, shape index: {}]   ;;  %s2691_s6 = inlined_call_operand.vmem [shape: f32[1,128], index: 6, kind: input, shape index: {}]   ;;  %s2692_s7 = inlined_call_operand.hbm [shape: f32[8,8,128], index: 7, kind: output, shape index: {}]  }
   0x1   :  { %13 = vsyncpa [#allocation7], 0 }
   0x2   :  { %14 = vsyncpa [#allocation5], 0  ;;  %s2044_s24 = smov [#allocation6]  }
   0x3   :  { %s34_s25 = sshll.u32 %s2044_s24, 4  ;;  %s35_s25 = int_to_ptr.vmem [resolvable:$true] %s34_s25 }
   0x4   :  { %s1966_s26 = scalar_lea.vmem %s35_s25, 4096  ;;  %p1971_p1 = scmp.lt.s32.totalorder %s35_s25, %s35_s25 }
   0x5   :  { %p1967_p0 = scmp.ne.s32.totalorder %s35_s25, %s1966_s26  ;;  %p1972_p2 = scmp.lt.s32.totalorder %s1966_s26, %s1966_s26 }
   0x7   :  { %p1973_p3 = por %p1972_p2, %p1971_p1 }
   0x9   :  { %p1974_p4 = pnand %p1973_p3, %p1967_p0 }
   0xb   :  { %1977 = shalt.err (!%p1974_p4)
}
   0xc   :  { %s2045_s27 = smov 256   ;;  %s2046_s28 = smov 16  }
   0xd   :  { %40 = dma.hbm_to_vmem [thread:$0]  %s2687_s2, 4096, %s35_s25, [#allocation7], %s2045_s27, %s2045_s27, %s2046_s28  }
   0xe   :  { %s2047_s8 = smov [#allocation3]  }
   0xf   :  { %s20_s9 = sshll.u32 %s2047_s8, 4  ;;  %s21_s9 = int_to_ptr.vmem [resolvable:$true] %s20_s9 }
  0x10   :  { %s1986_s10 = scalar_lea.vmem %s21_s9, 4096  ;;  %p1991_p6 = scmp.lt.s32.totalorder %s21_s9, %s21_s9 }
  0x11   :  { %p1987_p5 = scmp.ne.s32.totalorder %s21_s9, %s1986_s10  ;;  %p1992_p7 = scmp.lt.s32.totalorder %s1986_s10, %s1986_s10 }
  0x13   :  { %p1993_p8 = por %p1992_p7, %p1991_p6 }
  0x15   :  { %p1994_p9 = pnand %p1993_p8, %p1987_p5 }
  0x17   :  { %1997 = shalt.err (!%p1994_p9)
}
  0x18   :  { %s2048_s11 = smov 512   ;;  %s2049_s12 = smov 32  }
  0x19   :  { %26 = dma.hbm_to_vmem [thread:$0]  %s2685_s0, 4096, %s21_s9, [#allocation4], %s2048_s11, %s2048_s11, %s2049_s12  }
  0x1a   :  { %s2050_s15 = smov [#allocation8]  }
  0x1b   :  { %s50_s16 = sshll.u32 %s2050_s15, 4  ;;  %s51_s16 = int_to_ptr.vmem [resolvable:$true] %s50_s16 }
  0x1c   :  { %s2006_s2 = scalar_lea.vmem %s51_s16, 1024  ;;  %p2011_p11 = scmp.lt.s32.totalorder %s51_s16, %s51_s16 }
  0x1d   :  { %p2007_p10 = scmp.ne.s32.totalorder %s51_s16, %s2006_s2  ;;  %p2012_p12 = scmp.lt.s32.totalorder %s2006_s2, %s2006_s2 }
  0x1f   :  { %p2013_p13 = por %p2012_p12, %p2011_p11 }
  0x21   :  { %p2014_p0 = pnand %p2013_p13, %p2007_p10 }
  0x23   :  { %2017 = shalt.err (!%p2014_p0)
}
  0x24   :  { %s2051_s17 = smov 64   ;;  %s2052_s18 = smov 4  }
  0x25   :  { %56 = dma.hbm_to_vmem [thread:$0]  %s2690_s5, 1024, %s51_s16, [#allocation7], %s2051_s17, %s2051_s17, %s2052_s18  }
  0x26   :  { %2038 = dma.done.wait [#allocation4], 4096  }
  0x27   :  { %2039 = vsyncadd [#allocation4], 4294963200 }
  0x28   :  { %2040 = dma.done.wait [#allocation7], 5120  }
  0x29   :  { %2041 = vsyncadd [#allocation7], 4294962176  ;;  %v2053_v0 = vmov 0   ;;  %v2111_v1 = vld [vmem:[#allocation6 + $0xe4] ss:$16 sps:$4 sm:$0xff]   ;;  %v2054_v17 = vmov 0.0  }
  0x2a   :  { %301 = vmatprep.mubr.bf16.mxu1 %v2053_v0  ;;  %1708 = vset.pattern.permute.xlu0 %v2053_v0  ;;  %v2113_v2 = vld [vmem:[#allocation6 + $0xe0] ss:$16 sps:$4 sm:$0xff]   ;;  %v2116_v3 = vld [vmem:[#allocation6 + $0xc4] ss:$16 sps:$4 sm:$0xff]   ;;  %v2184_v22 = vld [vmem:[#allocation6 + $0xec] ss:$16 sps:$4 sm:$0xff]  }
  0x2b   :  { %433 = vmatprep.mubr.bf16.mxu0 %v2053_v0  ;;  %1709 = vset.pattern.permute.xlu1 %v2053_v0  ;;  %v2120_v4 = vld [vmem:[#allocation6 + $0xc0] ss:$16 sps:$4 sm:$0xff]   ;;  %v2124_v5 = vld [vmem:[#allocation6 + $0xa4] ss:$16 sps:$4 sm:$0xff]   ;;  %v2195_v25 = vld [vmem:[#allocation6 + $0xe8] ss:$16 sps:$4 sm:$0xff]  }
  0x2c   :  { %269 = vmatprep.subr.bf16.mxu1 %v2111_v1  ;;  %401 = vmatprep.subr.bf16.mxu0 %v2111_v1  ;;  %v2128_v6 = vld [vmem:[#allocation6 + $0xa0] ss:$16 sps:$4 sm:$0xff]   ;;  %v2132_v7 = vld [vmem:[#allocation6 + $0x84] ss:$16 sps:$4 sm:$0xff]   ;;  %v2199_v26 = vld [vmem:[#allocation6 + $0xcc] ss:$16 sps:$4 sm:$0xff]  }
  0x2d   :  { %270 = vmatpush1.bf16.msra.mxu1 %v2113_v2  ;;  %402 = vmatpush1.bf16.msra.mxu0 %v2113_v2  ;;  %v2136_v8 = vld [vmem:[#allocation6 + $0x80] ss:$16 sps:$4 sm:$0xff]   ;;  %v2140_v9 = vld [vmem:[#allocation6 + $0x64] ss:$16 sps:$4 sm:$0xff]   ;;  %v2204_v28 = vld [vmem:[#allocation6 + $0xc8] ss:$16 sps:$4 sm:$0xff]  }
  0x2e   :  { %271 = vmatprep.subr.bf16.mxu1 %v2116_v3  ;;  %403 = vmatprep.subr.bf16.mxu0 %v2116_v3  ;;  %v2144_v10 = vld [vmem:[#allocation6 + $0x60] ss:$16 sps:$4 sm:$0xff]   ;;  %v2148_v11 = vld [vmem:[#allocation6 + $0x44] ss:$16 sps:$4 sm:$0xff]   ;;  %v2208_v29 = vld [vmem:[#allocation6 + $0xac] ss:$16 sps:$4 sm:$0xff]  }
  0x2f   :  { %v2152_v12 = vld [vmem:[#allocation6 + $0x40] ss:$16 sps:$4 sm:$0xff]   ;;  %v2156_v13 = vld [vmem:[#allocation6 + $0x24] ss:$16 sps:$4 sm:$0xff]   ;;  %v2211_v30 = vld [vmem:[#allocation6 + $0xa8] ss:$16 sps:$4 sm:$0xff]  }
  0x30   :  { %v2162_v14 = vld [vmem:[%s2686_s1] sm:$0xff]  ;;  %v2214_v31 = vld [vmem:[#allocation6 + $0x8c] ss:$16 sps:$4 sm:$0xff]   ;;  %v2217_v32 = vld [vmem:[#allocation6 + $0x88] ss:$16 sps:$4 sm:$0xff]  }
  0x31   :  { %272 = vmatpush1.bf16.msra.mxu1 %v2120_v4  ;;  %404 = vmatpush1.bf16.msra.mxu0 %v2120_v4  ;;  %v2164_v15 = vld [vmem:[#allocation6 + $0x20] ss:$16 sps:$4 sm:$0xff]   ;;  %v2166_v16 = vld [vmem:[#allocation6 + $0x4] ss:$16 sps:$4 sm:$0xff]   ;;  %vm379_vm0 = vcmp.gt.s32.totalorder %v2162_v14, 0  ;;  %vm511_vm1 = vcmp.gt.s32.totalorder %v2162_v14, 1 }
  0x32   :  { %273 = vmatprep.subr.bf16.mxu1 %v2124_v5  ;;  %405 = vmatprep.subr.bf16.mxu0 %v2124_v5  ;;  %v1620_v18 = vsel %vm379_vm0, 1.0, %v2054_v17  ;;  %v1624_v19 = vsel %vm511_vm1, 1.0, %v2054_v17  ;;  %vm910_vm2 = vcmp.gt.s32.totalorder %v2162_v14, 4  ;;  %v2176_v20 = vld [vmem:[#allocation6] ss:$16 sps:$4 sm:$0xff]   ;;  %vm1176_vm3 = vcmp.gt.s32.totalorder %v2162_v14, 6 }
  0x33   :  { %385 = vperm.xlu0 %1708, %v1620_v18   ;;  %v2181_v21 = vld [vmem:[%s2688_s3] sm:$0xff]  ;;  %v1636_v23 = vsel %vm910_vm2, 1.0, %v2054_v17  ;;  %v1644_v27 = vsel %vm1176_vm3, 1.0, %v2054_v17  ;;  %v2220_v33 = vld [vmem:[#allocation6 + $0x6c] ss:$16 sps:$4 sm:$0xff]   ;;  %v106_v55 = vld [vmem:[#allocation3 + $0x10] sm:$0xff] }
  0x34   :  { %v108_v24 = vpack.c.bf16 %v2181_v21, %v2181_v21  ;;  %v2223_v34 = vld [vmem:[#allocation6 + $0x68] ss:$16 sps:$4 sm:$0xff]   ;;  %v2226_v35 = vld [vmem:[#allocation6 + $0x4c] ss:$16 sps:$4 sm:$0xff]   ;;  %v104_v44 = vld [vmem:[#allocation3] sm:$0xff]  ;;  %vm644_vm4 = vcmp.gt.s32.totalorder %v2162_v14, 2 }
  0x35   :  { %274 = vmatpush1.bf16.msra.mxu1 %v2128_v6  ;;  %406 = vmatpush1.bf16.msra.mxu0 %v2128_v6  ;;  %v2229_v36 = vld [vmem:[#allocation6 + $0x48] ss:$16 sps:$4 sm:$0xff]   ;;  %v2232_v37 = vld [vmem:[#allocation6 + $0x2c] ss:$16 sps:$4 sm:$0xff]   ;;  %vm777_vm5 = vcmp.gt.s32.totalorder %v2162_v14, 3  ;;  %vm1043_vm6 = vcmp.gt.s32.totalorder %v2162_v14, 5 }
  0x36   :  { %275 = vmatprep.subr.bf16.mxu1 %v2132_v7  ;;  %407 = vmatprep.subr.bf16.mxu0 %v2132_v7  ;;  %v2235_v38 = vld [vmem:[#allocation6 + $0x28] ss:$16 sps:$4 sm:$0xff]   ;;  %v2238_v39 = vld [vmem:[#allocation6 + $0xc] ss:$16 sps:$4 sm:$0xff]   ;;  %vm1309_vm7 = vcmp.gt.s32.totalorder %v2162_v14, 7 }
  0x37   :  { %517 = vperm.xlu0 %1708, %v1624_v19   ;;  %v2241_v40 = vld [vmem:[#allocation6 + $0x8] ss:$16 sps:$4 sm:$0xff]   ;;  %v103_v19 = vld [vmem:[%s2689_s4] sm:$0xff] }
  0x38   :  { %v105_v42 = vld [vmem:[#allocation3 + $0x8] sm:$0xff]  ;;  %v107_v57 = vld [vmem:[#allocation3 + $0x18] sm:$0xff] }
  0x39   :  { %276 = vmatpush1.bf16.msra.mxu1 %v2136_v8  ;;  %408 = vmatpush1.bf16.msra.mxu0 %v2136_v8  ;;  %v399_v14 = vld [vmem:[#allocation3 + $0x38] sm:$0xff] }
  0x3a   :  { %277 = vmatprep.subr.bf16.mxu1 %v2140_v9  ;;  %409 = vmatprep.subr.bf16.mxu0 %v2140_v9 }
  0x3b   :  { %916 = vperm.xlu0 %1708, %v1636_v23  }
  0x3d   :  { %278 = vmatpush1.bf16.msra.mxu1 %v2144_v10  ;;  %410 = vmatpush1.bf16.msra.mxu0 %v2144_v10 }
  0x3e   :  { %279 = vmatprep.subr.bf16.mxu1 %v2148_v11  ;;  %411 = vmatprep.subr.bf16.mxu0 %v2148_v11 }
  0x3f   :  { %1182 = vperm.xlu0 %1708, %v1644_v27  }
  0x41   :  { %280 = vmatpush1.bf16.msra.mxu1 %v2152_v12  ;;  %412 = vmatpush1.bf16.msra.mxu0 %v2152_v12 }
  0x42   :  { %281 = vmatprep.subr.bf16.mxu1 %v2156_v13  ;;  %413 = vmatprep.subr.bf16.mxu0 %v2156_v13 }
  0x45   :  { %282 = vmatpush1.bf16.msra.mxu1 %v2164_v15  ;;  %414 = vmatpush1.bf16.msra.mxu0 %v2164_v15 }
  0x46   :  { %283 = vmatprep.subr.bf16.mxu1 %v2166_v16  ;;  %415 = vmatprep.subr.bf16.mxu0 %v2166_v16 }
  0x49   :  { %284 = vmatpush1.bf16.msra.mxu1 %v2176_v20  ;;  %416 = vmatpush1.bf16.msra.mxu0 %v2176_v20 }
  0x4a   :  { %310 = vmatprep.subr.bf16.mxu1 %v2184_v22  ;;  %534 = vmatprep.subr.bf16.mxu0 %v2111_v1 }
  0x4c   :  { %302 = vmatmul.mubr.bf16.vlgmr.msra.gmra.mxu1 %v108_v24 }
  0x4d   :  { %311 = vmatpush1.bf16.msra.mxu1 %v2195_v25  ;;  %342 = vmatprep.mubr.bf16.mxu1 %v2053_v0 }
  0x4e   :  { %312 = vmatprep.subr.bf16.mxu1 %v2199_v26 }
  0x51   :  { %313 = vmatpush1.bf16.msra.mxu1 %v2204_v28 }
  0x52   :  { %314 = vmatprep.subr.bf16.mxu1 %v2208_v29 }
  0x55   :  { %315 = vmatpush1.bf16.msra.mxu1 %v2211_v30 }
  0x56   :  { %316 = vmatprep.subr.bf16.mxu1 %v2214_v31 }
  0x59   :  { %317 = vmatpush1.bf16.msra.mxu1 %v2217_v32 }
  0x5a   :  { %318 = vmatprep.subr.bf16.mxu1 %v2220_v33 }
  0x5d   :  { %319 = vmatpush1.bf16.msra.mxu1 %v2223_v34 }
  0x5e   :  { %320 = vmatprep.subr.bf16.mxu1 %v2226_v35 }
  0x61   :  { %321 = vmatpush1.bf16.msra.mxu1 %v2229_v36 }
  0x62   :  { %322 = vmatprep.subr.bf16.mxu1 %v2232_v37 }
  0x65   :  { %323 = vmatpush1.bf16.msra.mxu1 %v2235_v38 }
  0x66   :  { %324 = vmatprep.subr.bf16.mxu1 %v2238_v39 }
  0x69   :  { %325 = vmatpush1.bf16.msra.mxu1 %v2241_v40 }
  0x6a   :  { %442 = vmatprep.subr.bf16.mxu1 %v2184_v22 }
  0x6c   :  { %343 = vmatmul.mubr.bf16.vlgmr.msra.gmra.mxu1 %v108_v24 }
  0x6d   :  { %443 = vmatpush1.bf16.msra.mxu1 %v2195_v25  ;;  %474 = vmatprep.mubr.bf16.mxu1 %v2053_v0 }
  0x6e   :  { %444 = vmatprep.subr.bf16.mxu1 %v2199_v26 }
  0x71   :  { %445 = vmatpush1.bf16.msra.mxu1 %v2204_v28 }
  0x72   :  { %446 = vmatprep.subr.bf16.mxu1 %v2208_v29 }
  0x75   :  { %447 = vmatpush1.bf16.msra.mxu1 %v2211_v30 }
  0x76   :  { %448 = vmatprep.subr.bf16.mxu1 %v2214_v31 }
  0x79   :  { %449 = vmatpush1.bf16.msra.mxu1 %v2217_v32 }
  0x7a   :  { %450 = vmatprep.subr.bf16.mxu1 %v2220_v33 }
  0x7d   :  { %451 = vmatpush1.bf16.msra.mxu1 %v2223_v34 }
  0x7e   :  { %452 = vmatprep.subr.bf16.mxu1 %v2226_v35 }
  0x81   :  { %453 = vmatpush1.bf16.msra.mxu1 %v2229_v36 }
  0x82   :  { %454 = vmatprep.subr.bf16.mxu1 %v2232_v37 }
  0x85   :  { %455 = vmatpush1.bf16.msra.mxu1 %v2235_v38 }
  0x86   :  { %456 = vmatprep.subr.bf16.mxu1 %v2238_v39 }
  0x89   :  { %457 = vmatpush1.bf16.msra.mxu1 %v2241_v40 }
  0x8a   :  { %575 = vmatprep.subr.bf16.mxu1 %v2184_v22 }
 0x10c   :  { %v303_v41 = vpop.f32.mrf.mxu1 }
 0x10d   :  { %v351_v47 = vadd.f32 %v303_v41, %v104_v44  ;;  %v2266_v44 = vpop.permute.xlu0 %385 }
 0x10e   :  { %v305_v43 = vpop.f32.mrf.mxu1 }
 0x10f   :  { %v352_v46 = vadd.f32 %v305_v43, %v105_v42  ;;  %v1617_v50 = vmul.f32 -1.442695, %v351_v47 }
 0x110   :  { %v307_v45 = vpop.f32.mrf.mxu1 }
 0x111   :  { %v1618_v49 = vmul.f32 -1.442695, %v352_v46 }
 0x112   :  { %v308_v48 = vpop.f32.mrf.mxu1 }
 0x113   :  { %1766 = vpow2.f32 %v1618_v49 }
 0x114   :  { %1768 = vpow2.f32 %v1617_v50 }
 0x120   :  { %v1767_v51 = vpop.eup %1766 }
 0x121   :  { %v1769_v52 = vpop.eup %1768  ;;  %v364_v53 = vadd.f32 1.0, %v1767_v51 }
 0x122   :  { %v358_v54 = vadd.f32 1.0, %v1769_v52 }
 0x123   :  { %1770 = vrcp.f32 %v364_v53 }
 0x124   :  { %1772 = vrcp.f32 %v358_v54 }
 0x12c   :  { %v344_v56 = vpop.f32.mrf.mxu1 }
 0x12d   :  { %v353_v58 = vadd.f32 %v344_v56, %v106_v55  ;;  %v1632_v56 = vsel %vm777_vm5, 1.0, %v2054_v17 }
 0x12e   :  { %v346_v59 = vpop.f32.mrf.mxu1 }
 0x12f   :  { %1774 = vtanh.f32 %v353_v58  ;;  %v354_v60 = vadd.f32 %v346_v59, %v107_v57  ;;  %v1640_v57 = vsel %vm1043_vm6, 1.0, %v2054_v17  ;;  %v1648_v58 = vsel %vm1309_vm7, 1.0, %v2054_v17  ;;  %v396_v59 = vld [vmem:[#allocation3 + $0x20] sm:$0xff] }
 0x130   :  { %v348_v61 = vpop.f32.mrf.mxu1  ;;  %v1771_v18 = vpop.eup %1770 }
 0x131   :  { %v1619_v62 = vmul.f32 -1.442695, %v354_v60  ;;  %v1773_v23 = vpop.eup %1772  ;;  %v374_v27 = vmul.f32 %v1771_v18, %v103_v19 }
 0x132   :  { %v349_v63 = vpop.f32.mrf.mxu1 }
 0x133   :  { %1776 = vpow2.f32 %v1619_v62  ;;  %v397_v62 = vld [vmem:[#allocation3 + $0x28] sm:$0xff] }
 0x13c   :  { %v1775_v24 = vpop.eup %1774 }
 0x13d   :  { %v375_v41 = vmul.f32 %v1775_v24, %v1773_v23 }
 0x13f   :  { %v376_v42 = vadd.f32 %v375_v41, %v374_v27 }
 0x140   :  { %v1777_v43 = vpop.eup %1776 }
 0x141   :  { %v371_v45 = vadd.f32 1.0, %v1777_v43  ;;  %v390_v46 = vsub.f32 %v376_v42, %v103_v19  ;;  %1778 = vtanh.f32 %v376_v42 }
 0x143   :  { %1780 = vrcp.f32 %v371_v45  ;;  %v391_v47 = vmul.f32 %v390_v46, %v2266_v44 }
 0x145   :  { %v2269_v48 = vadd.f32 %v391_v47, %v103_v19 }
 0x14e   :  { %v1779_v49 = vpop.eup %1778 }
 0x150   :  { %v1781_v50 = vpop.eup %1780 }
 0x151   :  { %v378_v51 = vmul.f32 %v1781_v50, %v1779_v49 }
 0x153   :  { %v382_v52 = vsub.f32 %v378_v51, %v2181_v21 }
 0x155   :  { %v388_v53 = vmul.f32 %v2266_v44, %v382_v52 }
 0x157   :  { %v2274_v54 = vadd.f32 %v388_v53, %v2181_v21  ;;  %v1628_v21 = vsel %vm644_vm4, 1.0, %v2054_v17  ;;  %v398_v17 = vld [vmem:[#allocation3 + $0x30] sm:$0xff] }
 0x158   :  { %650 = vperm.xlu1 %1709, %v1628_v21  }
 0x159   :  { %v400_v55 = vpack.c.bf16 %v2274_v54, %v2274_v54 }
 0x15b   :  { %434 = vmatmul.mubr.bf16.vlgmr.msra.gmra.mxu0 %v400_v55  ;;  %475 = vmatmul.mubr.bf16.vlgmr.msra.gmra.mxu1 %v400_v55 }
 0x15c   :  { %535 = vmatpush1.bf16.msra.mxu0 %v2113_v2  ;;  %576 = vmatpush1.bf16.msra.mxu1 %v2195_v25 }
 0x15d   :  { %536 = vmatprep.subr.bf16.mxu0 %v2116_v3  ;;  %577 = vmatprep.subr.bf16.mxu1 %v2199_v26 }
 0x15e   :  { %566 = vmatprep.mubr.bf16.mxu0 %v2053_v0  ;;  %607 = vmatprep.mubr.bf16.mxu1 %v2053_v0 }
 0x15f   :  { %783 = vperm.xlu1 %1709, %v1632_v56  }
 0x160   :  { %537 = vmatpush1.bf16.msra.mxu0 %v2120_v4  ;;  %578 = vmatpush1.bf16.msra.mxu1 %v2204_v28 }
 0x161   :  { %538 = vmatprep.subr.bf16.mxu0 %v2124_v5  ;;  %579 = vmatprep.subr.bf16.mxu1 %v2208_v29 }
 0x163   :  { %1049 = vperm.xlu1 %1709, %v1640_v57  }
 0x164   :  { %539 = vmatpush1.bf16.msra.mxu0 %v2128_v6  ;;  %580 = vmatpush1.bf16.msra.mxu1 %v2211_v30 }
 0x165   :  { %540 = vmatprep.subr.bf16.mxu0 %v2132_v7  ;;  %581 = vmatprep.subr.bf16.mxu1 %v2214_v31 }
 0x167   :  { %1315 = vperm.xlu1 %1709, %v1648_v58  }
 0x168   :  { %541 = vmatpush1.bf16.msra.mxu0 %v2136_v8  ;;  %582 = vmatpush1.bf16.msra.mxu1 %v2217_v32 }
 0x169   :  { %542 = vmatprep.subr.bf16.mxu0 %v2140_v9  ;;  %583 = vmatprep.subr.bf16.mxu1 %v2220_v33 }
 0x16c   :  { %543 = vmatpush1.bf16.msra.mxu0 %v2144_v10  ;;  %584 = vmatpush1.bf16.msra.mxu1 %v2223_v34 }
 0x16d   :  { %544 = vmatprep.subr.bf16.mxu0 %v2148_v11  ;;  %585 = vmatprep.subr.bf16.mxu1 %v2226_v35 }
 0x170   :  { %545 = vmatpush1.bf16.msra.mxu0 %v2152_v12  ;;  %586 = vmatpush1.bf16.msra.mxu1 %v2229_v36 }
 0x171   :  { %546 = vmatprep.subr.bf16.mxu0 %v2156_v13  ;;  %587 = vmatprep.subr.bf16.mxu1 %v2232_v37 }
 0x174   :  { %547 = vmatpush1.bf16.msra.mxu0 %v2164_v15  ;;  %588 = vmatpush1.bf16.msra.mxu1 %v2235_v38 }
 0x175   :  { %548 = vmatprep.subr.bf16.mxu0 %v2166_v16  ;;  %589 = vmatprep.subr.bf16.mxu1 %v2238_v39 }
 0x178   :  { %549 = vmatpush1.bf16.msra.mxu0 %v2176_v20  ;;  %590 = vmatpush1.bf16.msra.mxu1 %v2241_v40 }
 0x179   :  { %667 = vmatprep.subr.bf16.mxu0 %v2111_v1  ;;  %708 = vmatprep.subr.bf16.mxu1 %v2184_v22 }
 0x21b   :  { %v435_v60 = vpop.f32.mrf.mxu0  ;;  %v476_v61 = vpop.f32.mrf.mxu1 }
 0x21c   :  { %v483_v63 = vadd.f32 %v435_v60, %v396_v59  ;;  %v485_v50 = vadd.f32 %v476_v61, %v398_v17  ;;  %v530_v17 = vld [vmem:[#allocation3 + $0x48] sm:$0xff] }
 0x21d   :  { %v437_v18 = vpop.f32.mrf.mxu0  ;;  %v478_v19 = vpop.f32.mrf.mxu1 }
 0x21e   :  { %v1621_v23 = vmul.f32 -1.442695, %v483_v63  ;;  %v484_v24 = vadd.f32 %v437_v18, %v397_v62  ;;  %v486_v46 = vadd.f32 %v478_v19, %v399_v14  ;;  %v2322_v63 = vpop.permute.xlu0 %517 }
 0x21f   :  { %v439_v27 = vpop.f32.mrf.mxu0  ;;  %v480_v41 = vpop.f32.mrf.mxu1 }
 0x220   :  { %1782 = vpow2.f32 %v1621_v23  ;;  %v1622_v42 = vmul.f32 -1.442695, %v484_v24  ;;  %v1623_v47 = vmul.f32 -1.442695, %v486_v46 }
 0x221   :  { %v440_v43 = vpop.f32.mrf.mxu0  ;;  %v481_v45 = vpop.f32.mrf.mxu1 }
 0x222   :  { %1784 = vpow2.f32 %v1622_v42 }
 0x223   :  { %1786 = vpow2.f32 %v1623_v47 }
 0x22d   :  { %v1783_v49 = vpop.eup %1782 }
 0x22e   :  { %v490_v51 = vadd.f32 1.0, %v1783_v49 }
 0x22f   :  { %v1785_v52 = vpop.eup %1784 }
 0x230   :  { %1788 = vrcp.f32 %v490_v51  ;;  %v496_v53 = vadd.f32 1.0, %v1785_v52  ;;  %v1787_v55 = vpop.eup %1786 }
 0x231   :  { %1790 = vtanh.f32 %v485_v50  ;;  %v503_v58 = vadd.f32 1.0, %v1787_v55 }
 0x232   :  { %1792 = vrcp.f32 %v496_v53 }
 0x233   :  { %1794 = vrcp.f32 %v503_v58  ;;  %v532_v58 = vld [vmem:[#allocation3 + $0x58] sm:$0xff] }
 0x23d   :  { %v1789_v21 = vpop.eup %1788 }
 0x23e   :  { %v1791_v56 = vpop.eup %1790 }
 0x23f   :  { %v1793_v57 = vpop.eup %1792  ;;  %v507_v59 = vmul.f32 %v1791_v56, %v1789_v21 }
 0x240   :  { %v506_v60 = vmul.f32 %v1793_v57, %v2269_v48  ;;  %v1795_v23 = vpop.eup %1794 }
 0x242   :  { %v508_v62 = vadd.f32 %v507_v59, %v506_v60  ;;  %v531_v60 = vld [vmem:[#allocation3 + $0x50] sm:$0xff] }
 0x244   :  { %1796 = vtanh.f32 %v508_v62  ;;  %v522_v61 = vsub.f32 %v508_v62, %v2269_v48 }
 0x246   :  { %v523_v18 = vmul.f32 %v522_v61, %v2322_v63 }
 0x248   :  { %v2326_v19 = vadd.f32 %v523_v18, %v2269_v48  ;;  %v529_v48 = vld [vmem:[#allocation3 + $0x40] sm:$0xff] }
 0x251   :  { %v1797_v24 = vpop.eup %1796 }
 0x252   :  { %v510_v27 = vmul.f32 %v1797_v24, %v1795_v23 }
 0x254   :  { %v514_v41 = vsub.f32 %v510_v27, %v2274_v54 }
 0x256   :  { %v520_v42 = vmul.f32 %v2322_v63, %v514_v41 }
 0x258   :  { %v2331_v43 = vadd.f32 %v520_v42, %v2274_v54 }
 0x25a   :  { %v533_v45 = vpack.c.bf16 %v2331_v43, %v2331_v43 }
 0x25c   :  { %567 = vmatmul.mubr.bf16.vlgmr.msra.gmra.mxu0 %v533_v45  ;;  %608 = vmatmul.mubr.bf16.vlgmr.msra.gmra.mxu1 %v533_v45 }
 0x25d   :  { %668 = vmatpush1.bf16.msra.mxu0 %v2113_v2  ;;  %709 = vmatpush1.bf16.msra.mxu1 %v2195_v25 }
 0x25e   :  { %669 = vmatprep.subr.bf16.mxu0 %v2116_v3  ;;  %710 = vmatprep.subr.bf16.mxu1 %v2199_v26 }
 0x25f   :  { %699 = vmatprep.mubr.bf16.mxu0 %v2053_v0  ;;  %740 = vmatprep.mubr.bf16.mxu1 %v2053_v0 }
 0x261   :  { %670 = vmatpush1.bf16.msra.mxu0 %v2120_v4  ;;  %711 = vmatpush1.bf16.msra.mxu1 %v2204_v28 }
 0x262   :  { %671 = vmatprep.subr.bf16.mxu0 %v2124_v5  ;;  %712 = vmatprep.subr.bf16.mxu1 %v2208_v29 }
 0x265   :  { %672 = vmatpush1.bf16.msra.mxu0 %v2128_v6  ;;  %713 = vmatpush1.bf16.msra.mxu1 %v2211_v30 }
 0x266   :  { %673 = vmatprep.subr.bf16.mxu0 %v2132_v7  ;;  %714 = vmatprep.subr.bf16.mxu1 %v2214_v31 }
 0x269   :  { %674 = vmatpush1.bf16.msra.mxu0 %v2136_v8  ;;  %715 = vmatpush1.bf16.msra.mxu1 %v2217_v32 }
 0x26a   :  { %675 = vmatprep.subr.bf16.mxu0 %v2140_v9  ;;  %716 = vmatprep.subr.bf16.mxu1 %v2220_v33 }
 0x26d   :  { %676 = vmatpush1.bf16.msra.mxu0 %v2144_v10  ;;  %717 = vmatpush1.bf16.msra.mxu1 %v2223_v34 }
 0x26e   :  { %677 = vmatprep.subr.bf16.mxu0 %v2148_v11  ;;  %718 = vmatprep.subr.bf16.mxu1 %v2226_v35 }
 0x271   :  { %678 = vmatpush1.bf16.msra.mxu0 %v2152_v12  ;;  %719 = vmatpush1.bf16.msra.mxu1 %v2229_v36 }
 0x272   :  { %679 = vmatprep.subr.bf16.mxu0 %v2156_v13  ;;  %720 = vmatprep.subr.bf16.mxu1 %v2232_v37 }
 0x275   :  { %680 = vmatpush1.bf16.msra.mxu0 %v2164_v15  ;;  %721 = vmatpush1.bf16.msra.mxu1 %v2235_v38 }
 0x276   :  { %681 = vmatprep.subr.bf16.mxu0 %v2166_v16  ;;  %722 = vmatprep.subr.bf16.mxu1 %v2238_v39 }
 0x279   :  { %682 = vmatpush1.bf16.msra.mxu0 %v2176_v20  ;;  %723 = vmatpush1.bf16.msra.mxu1 %v2241_v40 }
 0x27a   :  { %800 = vmatprep.subr.bf16.mxu0 %v2111_v1  ;;  %841 = vmatprep.subr.bf16.mxu1 %v2184_v22 }
 0x31c   :  { %v568_v14 = vpop.f32.mrf.mxu0  ;;  %v609_v46 = vpop.f32.mrf.mxu1 }
 0x31d   :  { %v616_v47 = vadd.f32 %v568_v14, %v529_v48  ;;  %v618_v18 = vadd.f32 %v609_v46, %v531_v60 }
 0x31e   :  { %v570_v49 = vpop.f32.mrf.mxu0  ;;  %v611_v50 = vpop.f32.mrf.mxu1 }
 0x31f   :  { %v1625_v51 = vmul.f32 -1.442695, %v616_v47  ;;  %v617_v52 = vadd.f32 %v570_v49, %v530_v17  ;;  %v619_v59 = vadd.f32 %v611_v50, %v532_v58  ;;  %v2370_v50 = vpop.permute.xlu1 %650 }
 0x320   :  { %v572_v53 = vpop.f32.mrf.mxu0  ;;  %v613_v55 = vpop.f32.mrf.mxu1 }
 0x321   :  { %1798 = vpow2.f32 %v1625_v51  ;;  %v1626_v21 = vmul.f32 -1.442695, %v617_v52  ;;  %v1627_v62 = vmul.f32 -1.442695, %v619_v59 }
 0x322   :  { %v573_v56 = vpop.f32.mrf.mxu0  ;;  %v614_v57 = vpop.f32.mrf.mxu1 }
 0x323   :  { %1800 = vpow2.f32 %v1626_v21 }
 0x324   :  { %1802 = vpow2.f32 %v1627_v62 }
 0x32e   :  { %v1799_v61 = vpop.eup %1798 }
 0x32f   :  { %v623_v23 = vadd.f32 1.0, %v1799_v61  ;;  %v663_v61 = vld [vmem:[#allocation3 + $0x68] sm:$0xff] }
 0x330   :  { %v1801_v24 = vpop.eup %1800 }
 0x331   :  { %1804 = vrcp.f32 %v623_v23  ;;  %v629_v27 = vadd.f32 1.0, %v1801_v24  ;;  %v1803_v41 = vpop.eup %1802 }
 0x332   :  { %1806 = vtanh.f32 %v618_v18  ;;  %v636_v14 = vadd.f32 1.0, %v1803_v41 }
 0x333   :  { %1808 = vrcp.f32 %v629_v27 }
 0x334   :  { %1810 = vrcp.f32 %v636_v14 }
 0x33e   :  { %v1805_v42 = vpop.eup %1804 }
 0x33f   :  { %v1807_v45 = vpop.eup %1806 }
 0x340   :  { %v1809_v48 = vpop.eup %1808  ;;  %v640_v47 = vmul.f32 %v1807_v45, %v1805_v42 }
 0x341   :  { %v639_v17 = vmul.f32 %v1809_v48, %v2326_v19  ;;  %v1811_v53 = vpop.eup %1810 }
 0x343   :  { %v641_v49 = vadd.f32 %v640_v47, %v639_v17  ;;  %v665_v47 = vld [vmem:[#allocation3 + $0x78] sm:$0xff] }
 0x345   :  { %1812 = vtanh.f32 %v641_v49  ;;  %v655_v46 = vsub.f32 %v641_v49, %v2326_v19  ;;  %v664_v49 = vld [vmem:[#allocation3 + $0x70] sm:$0xff] }
 0x347   :  { %v656_v51 = vmul.f32 %v655_v46, %v2370_v50 }
 0x349   :  { %v2375_v52 = vadd.f32 %v656_v51, %v2326_v19  ;;  %v662_v19 = vld [vmem:[#allocation3 + $0x60] sm:$0xff] }
 0x352   :  { %v1813_v55 = vpop.eup %1812 }
 0x353   :  { %v643_v21 = vmul.f32 %v1813_v55, %v1811_v53 }
 0x355   :  { %v647_v56 = vsub.f32 %v643_v21, %v2331_v43 }
 0x357   :  { %v653_v57 = vmul.f32 %v2370_v50, %v647_v56 }
 0x359   :  { %v2380_v58 = vadd.f32 %v653_v57, %v2331_v43 }
 0x35b   :  { %v666_v59 = vpack.c.bf16 %v2380_v58, %v2380_v58 }
 0x35d   :  { %700 = vmatmul.mubr.bf16.vlgmr.msra.gmra.mxu0 %v666_v59  ;;  %741 = vmatmul.mubr.bf16.vlgmr.msra.gmra.mxu1 %v666_v59 }
 0x35e   :  { %801 = vmatpush1.bf16.msra.mxu0 %v2113_v2  ;;  %842 = vmatpush1.bf16.msra.mxu1 %v2195_v25 }
 0x35f   :  { %802 = vmatprep.subr.bf16.mxu0 %v2116_v3  ;;  %843 = vmatprep.subr.bf16.mxu1 %v2199_v26 }
 0x360   :  { %832 = vmatprep.mubr.bf16.mxu0 %v2053_v0  ;;  %873 = vmatprep.mubr.bf16.mxu1 %v2053_v0 }
 0x362   :  { %803 = vmatpush1.bf16.msra.mxu0 %v2120_v4  ;;  %844 = vmatpush1.bf16.msra.mxu1 %v2204_v28 }
 0x363   :  { %804 = vmatprep.subr.bf16.mxu0 %v2124_v5  ;;  %845 = vmatprep.subr.bf16.mxu1 %v2208_v29 }
 0x366   :  { %805 = vmatpush1.bf16.msra.mxu0 %v2128_v6  ;;  %846 = vmatpush1.bf16.msra.mxu1 %v2211_v30 }
 0x367   :  { %806 = vmatprep.subr.bf16.mxu0 %v2132_v7  ;;  %847 = vmatprep.subr.bf16.mxu1 %v2214_v31 }
 0x36a   :  { %807 = vmatpush1.bf16.msra.mxu0 %v2136_v8  ;;  %848 = vmatpush1.bf16.msra.mxu1 %v2217_v32 }
 0x36b   :  { %808 = vmatprep.subr.bf16.mxu0 %v2140_v9  ;;  %849 = vmatprep.subr.bf16.mxu1 %v2220_v33 }
 0x36e   :  { %809 = vmatpush1.bf16.msra.mxu0 %v2144_v10  ;;  %850 = vmatpush1.bf16.msra.mxu1 %v2223_v34 }
 0x36f   :  { %810 = vmatprep.subr.bf16.mxu0 %v2148_v11  ;;  %851 = vmatprep.subr.bf16.mxu1 %v2226_v35 }
 0x372   :  { %811 = vmatpush1.bf16.msra.mxu0 %v2152_v12  ;;  %852 = vmatpush1.bf16.msra.mxu1 %v2229_v36 }
 0x373   :  { %812 = vmatprep.subr.bf16.mxu0 %v2156_v13  ;;  %853 = vmatprep.subr.bf16.mxu1 %v2232_v37 }
 0x376   :  { %813 = vmatpush1.bf16.msra.mxu0 %v2164_v15  ;;  %854 = vmatpush1.bf16.msra.mxu1 %v2235_v38 }
 0x377   :  { %814 = vmatprep.subr.bf16.mxu0 %v2166_v16  ;;  %855 = vmatprep.subr.bf16.mxu1 %v2238_v39 }
 0x37a   :  { %815 = vmatpush1.bf16.msra.mxu0 %v2176_v20  ;;  %856 = vmatpush1.bf16.msra.mxu1 %v2241_v40 }
 0x37b   :  { %933 = vmatprep.subr.bf16.mxu0 %v2111_v1  ;;  %974 = vmatprep.subr.bf16.mxu1 %v2184_v22 }
 0x41d   :  { %v701_v60 = vpop.f32.mrf.mxu0  ;;  %v742_v62 = vpop.f32.mrf.mxu1 }
 0x41e   :  { %v749_v18 = vadd.f32 %v701_v60, %v662_v19  ;;  %v751_v53 = vadd.f32 %v742_v62, %v664_v49 }
 0x41f   :  { %v703_v23 = vpop.f32.mrf.mxu0  ;;  %v744_v24 = vpop.f32.mrf.mxu1 }
 0x420   :  { %v1629_v27 = vmul.f32 -1.442695, %v749_v18  ;;  %v750_v41 = vadd.f32 %v703_v23, %v663_v61  ;;  %v752_v1 = vadd.f32 %v744_v24, %v665_v47 }
 0x421   :  { %v705_v42 = vpop.f32.mrf.mxu0  ;;  %v746_v45 = vpop.f32.mrf.mxu1 }
 0x422   :  { %1814 = vpow2.f32 %v1629_v27  ;;  %v1630_v48 = vmul.f32 -1.442695, %v750_v41  ;;  %v1631_v46 = vmul.f32 -1.442695, %v752_v1  ;;  %v2420_v27 = vpop.permute.xlu1 %783 }
 0x423   :  { %v706_v14 = vpop.f32.mrf.mxu0  ;;  %v747_v17 = vpop.f32.mrf.mxu1 }
 0x424   :  { %1816 = vpow2.f32 %v1630_v48 }
 0x425   :  { %1818 = vpow2.f32 %v1631_v46 }
 0x42f   :  { %v1815_v51 = vpop.eup %1814 }
 0x430   :  { %v756_v55 = vadd.f32 1.0, %v1815_v51  ;;  %v797_v51 = vld [vmem:[#allocation3 + $0x90] sm:$0xff] }
 0x431   :  { %v1817_v21 = vpop.eup %1816 }
 0x432   :  { %1820 = vrcp.f32 %v756_v55  ;;  %v762_v56 = vadd.f32 1.0, %v1817_v21  ;;  %v1819_v57 = vpop.eup %1818 }
 0x433   :  { %1822 = vtanh.f32 %v751_v53  ;;  %v769_v61 = vadd.f32 1.0, %v1819_v57 }
 0x434   :  { %1824 = vrcp.f32 %v762_v56 }
 0x435   :  { %1826 = vrcp.f32 %v769_v61 }
 0x43f   :  { %v1821_v59 = vpop.eup %1820 }
 0x440   :  { %v1823_v19 = vpop.eup %1822 }
 0x441   :  { %v1825_v60 = vpop.eup %1824  ;;  %v773_v18 = vmul.f32 %v1823_v19, %v1821_v59 }
 0x442   :  { %v772_v23 = vmul.f32 %v1825_v60, %v2375_v52  ;;  %v1827_v45 = vpop.eup %1826 }
 0x444   :  { %v774_v24 = vadd.f32 %v773_v18, %v772_v23 }
 0x446   :  { %1828 = vtanh.f32 %v774_v24  ;;  %v788_v62 = vsub.f32 %v774_v24, %v2375_v52 }
 0x448   :  { %v789_v41 = vmul.f32 %v788_v62, %v2420_v27 }
 0x44a   :  { %v2424_v42 = vadd.f32 %v789_v41, %v2375_v52  ;;  %v798_v52 = vld [vmem:[#allocation3 + $0x98] sm:$0xff] }
 0x453   :  { %v1829_v48 = vpop.eup %1828 }
 0x454   :  { %v776_v14 = vmul.f32 %v1829_v48, %v1827_v45  ;;  %v2471_v45 = vpop.permute.xlu0 %916 }
 0x456   :  { %v780_v17 = vsub.f32 %v776_v14, %v2380_v58 }
 0x458   :  { %v786_v47 = vmul.f32 %v2420_v27, %v780_v17 }
 0x45a   :  { %v2429_v1 = vadd.f32 %v786_v47, %v2380_v58 }
 0x45c   :  { %v799_v49 = vpack.c.bf16 %v2429_v1, %v2429_v1 }
 0x45e   :  { %833 = vmatmul.mubr.bf16.vlgmr.msra.gmra.mxu0 %v799_v49  ;;  %874 = vmatmul.mubr.bf16.vlgmr.msra.gmra.mxu1 %v799_v49 }
 0x45f   :  { %934 = vmatpush1.bf16.msra.mxu0 %v2113_v2  ;;  %975 = vmatpush1.bf16.msra.mxu1 %v2195_v25  ;;  %v2465_v2 = vld [vmem:[#allocation6 + $0xe4] ss:$16 sps:$4 sm:$0xff]  }
 0x460   :  { %935 = vmatprep.subr.bf16.mxu0 %v2116_v3  ;;  %976 = vmatprep.subr.bf16.mxu1 %v2199_v26  ;;  %v795_v3 = vld [vmem:[#allocation3 + $0x80] sm:$0xff] }
 0x461   :  { %965 = vmatprep.mubr.bf16.mxu0 %v2053_v0  ;;  %1006 = vmatprep.mubr.bf16.mxu1 %v2053_v0 }
 0x463   :  { %936 = vmatpush1.bf16.msra.mxu0 %v2120_v4  ;;  %977 = vmatpush1.bf16.msra.mxu1 %v2204_v28 }
 0x464   :  { %937 = vmatprep.subr.bf16.mxu0 %v2124_v5  ;;  %978 = vmatprep.subr.bf16.mxu1 %v2208_v29 }
 0x467   :  { %938 = vmatpush1.bf16.msra.mxu0 %v2128_v6  ;;  %979 = vmatpush1.bf16.msra.mxu1 %v2211_v30  ;;  %v796_v6 = vld [vmem:[#allocation3 + $0x88] sm:$0xff] }
 0x468   :  { %939 = vmatprep.subr.bf16.mxu0 %v2132_v7  ;;  %980 = vmatprep.subr.bf16.mxu1 %v2214_v31 }
 0x46b   :  { %940 = vmatpush1.bf16.msra.mxu0 %v2136_v8  ;;  %981 = vmatpush1.bf16.msra.mxu1 %v2217_v32 }
 0x46c   :  { %941 = vmatprep.subr.bf16.mxu0 %v2140_v9  ;;  %982 = vmatprep.subr.bf16.mxu1 %v2220_v33 }
 0x46f   :  { %942 = vmatpush1.bf16.msra.mxu0 %v2144_v10  ;;  %983 = vmatpush1.bf16.msra.mxu1 %v2223_v34 }
 0x470   :  { %943 = vmatprep.subr.bf16.mxu0 %v2148_v11  ;;  %984 = vmatprep.subr.bf16.mxu1 %v2226_v35 }
 0x473   :  { %944 = vmatpush1.bf16.msra.mxu0 %v2152_v12  ;;  %985 = vmatpush1.bf16.msra.mxu1 %v2229_v36 }
 0x474   :  { %945 = vmatprep.subr.bf16.mxu0 %v2156_v13  ;;  %986 = vmatprep.subr.bf16.mxu1 %v2232_v37 }
 0x477   :  { %946 = vmatpush1.bf16.msra.mxu0 %v2164_v15  ;;  %987 = vmatpush1.bf16.msra.mxu1 %v2235_v38 }
 0x478   :  { %947 = vmatprep.subr.bf16.mxu0 %v2166_v16  ;;  %988 = vmatprep.subr.bf16.mxu1 %v2238_v39 }
 0x47b   :  { %948 = vmatpush1.bf16.msra.mxu0 %v2176_v20  ;;  %989 = vmatpush1.bf16.msra.mxu1 %v2241_v40 }
 0x47c   :  { %1066 = vmatprep.subr.bf16.mxu0 %v2465_v2  ;;  %1107 = vmatprep.subr.bf16.mxu1 %v2184_v22 }
 0x51e   :  { %v834_v4 = vpop.f32.mrf.mxu0  ;;  %v875_v5 = vpop.f32.mrf.mxu1 }
 0x51f   :  { %v882_v7 = vadd.f32 %v834_v4, %v795_v3  ;;  %v884_v55 = vadd.f32 %v875_v5, %v797_v51 }
 0x520   :  { %v836_v8 = vpop.f32.mrf.mxu0  ;;  %v877_v9 = vpop.f32.mrf.mxu1 }
 0x521   :  { %v1633_v10 = vmul.f32 -1.442695, %v882_v7  ;;  %v883_v11 = vadd.f32 %v836_v8, %v796_v6  ;;  %v885_v46 = vadd.f32 %v877_v9, %v798_v52  ;;  %v2484_v7 = vld [vmem:[#allocation6 + $0xe0] ss:$16 sps:$4 sm:$0xff]   ;;  %v2498_v9 = vld [vmem:[#allocation6 + $0xa4] ss:$16 sps:$4 sm:$0xff]  }
 0x522   :  { %v838_v12 = vpop.f32.mrf.mxu0  ;;  %v879_v13 = vpop.f32.mrf.mxu1  ;;  %v2494_v8 = vld [vmem:[#allocation6 + $0xc0] ss:$16 sps:$4 sm:$0xff]  }
 0x523   :  { %1830 = vpow2.f32 %v1633_v10  ;;  %v1634_v15 = vmul.f32 -1.442695, %v883_v11  ;;  %v1635_v22 = vmul.f32 -1.442695, %v885_v46  ;;  %v2510_v10 = vld [vmem:[#allocation6 + $0x80] ss:$16 sps:$4 sm:$0xff]  }
 0x524   :  { %v839_v16 = vpop.f32.mrf.mxu0  ;;  %v880_v20 = vpop.f32.mrf.mxu1 }
 0x525   :  { %1832 = vpow2.f32 %v1634_v15 }
 0x526   :  { %1834 = vpow2.f32 %v1635_v22 }
 0x530   :  { %v1831_v53 = vpop.eup %1830 }
 0x531   :  { %v889_v21 = vadd.f32 1.0, %v1831_v53 }
 0x532   :  { %v1833_v56 = vpop.eup %1832 }
 0x533   :  { %1836 = vrcp.f32 %v889_v21  ;;  %v895_v57 = vadd.f32 1.0, %v1833_v56  ;;  %v1835_v59 = vpop.eup %1834 }
 0x534   :  { %1838 = vtanh.f32 %v884_v55  ;;  %v902_v18 = vadd.f32 1.0, %v1835_v59  ;;  %v930_v55 = vld [vmem:[#allocation3 + $0xb0] sm:$0xff] }
 0x535   :  { %1840 = vrcp.f32 %v895_v57 }
 0x536   :  { %1842 = vrcp.f32 %v902_v18 }
 0x540   :  { %v1837_v19 = vpop.eup %1836 }
 0x541   :  { %v1839_v60 = vpop.eup %1838 }
 0x542   :  { %v1841_v61 = vpop.eup %1840  ;;  %v906_v23 = vmul.f32 %v1839_v60, %v1837_v19 }
 0x543   :  { %v905_v24 = vmul.f32 %v1841_v61, %v2424_v42  ;;  %v1843_v17 = vpop.eup %1842 }
 0x545   :  { %v907_v62 = vadd.f32 %v906_v23, %v905_v24 }
 0x547   :  { %1844 = vtanh.f32 %v907_v62  ;;  %v921_v41 = vsub.f32 %v907_v62, %v2424_v42 }
 0x549   :  { %v922_v48 = vmul.f32 %v921_v41, %v2471_v45 }
 0x54b   :  { %v2475_v14 = vadd.f32 %v922_v48, %v2424_v42  ;;  %v2488_v42 = vld [vmem:[#allocation6 + $0xc4] ss:$16 sps:$4 sm:$0xff]  }
 0x554   :  { %v1845_v47 = vpop.eup %1844 }
 0x555   :  { %v909_v49 = vmul.f32 %v1845_v47, %v1843_v17 }
 0x557   :  { %v913_v3 = vsub.f32 %v909_v49, %v2429_v1  ;;  %v2549_v49 = vpop.permute.xlu1 %1049 }
 0x559   :  { %v919_v4 = vmul.f32 %v2471_v45, %v913_v3 }
 0x55b   :  { %v2480_v5 = vadd.f32 %v919_v4, %v2429_v1 }
 0x55d   :  { %v932_v6 = vpack.c.bf16 %v2480_v5, %v2480_v5 }
 0x55f   :  { %966 = vmatmul.mubr.bf16.vlgmr.msra.gmra.mxu0 %v932_v6  ;;  %1007 = vmatmul.mubr.bf16.vlgmr.msra.gmra.mxu1 %v932_v6 }
 0x560   :  { %1067 = vmatpush1.bf16.msra.mxu0 %v2484_v7  ;;  %1108 = vmatpush1.bf16.msra.mxu1 %v2195_v25  ;;  %v2502_v25 = vld [vmem:[#allocation6 + $0xa0] ss:$16 sps:$4 sm:$0xff]  }
 0x561   :  { %1068 = vmatprep.subr.bf16.mxu0 %v2488_v42  ;;  %1109 = vmatprep.subr.bf16.mxu1 %v2199_v26  ;;  %v2506_v26 = vld [vmem:[#allocation6 + $0x84] ss:$16 sps:$4 sm:$0xff]  }
 0x562   :  { %1098 = vmatprep.mubr.bf16.mxu0 %v2053_v0  ;;  %1139 = vmatprep.mubr.bf16.mxu1 %v2053_v0 }
 0x564   :  { %1069 = vmatpush1.bf16.msra.mxu0 %v2494_v8  ;;  %1110 = vmatpush1.bf16.msra.mxu1 %v2204_v28  ;;  %v2514_v28 = vld [vmem:[#allocation6 + $0x64] ss:$16 sps:$4 sm:$0xff]  }
 0x565   :  { %1070 = vmatprep.subr.bf16.mxu0 %v2498_v9  ;;  %1111 = vmatprep.subr.bf16.mxu1 %v2208_v29  ;;  %v2518_v29 = vld [vmem:[#allocation6 + $0x60] ss:$16 sps:$4 sm:$0xff]  }
 0x568   :  { %1071 = vmatpush1.bf16.msra.mxu0 %v2502_v25  ;;  %1112 = vmatpush1.bf16.msra.mxu1 %v2211_v30  ;;  %v2522_v30 = vld [vmem:[#allocation6 + $0x44] ss:$16 sps:$4 sm:$0xff]  }
 0x569   :  { %1072 = vmatprep.subr.bf16.mxu0 %v2506_v26  ;;  %1113 = vmatprep.subr.bf16.mxu1 %v2214_v31  ;;  %v2526_v31 = vld [vmem:[#allocation6 + $0x40] ss:$16 sps:$4 sm:$0xff]  }
 0x56c   :  { %1073 = vmatpush1.bf16.msra.mxu0 %v2510_v10  ;;  %1114 = vmatpush1.bf16.msra.mxu1 %v2217_v32  ;;  %v2530_v32 = vld [vmem:[#allocation6 + $0x24] ss:$16 sps:$4 sm:$0xff]  }
 0x56d   :  { %1074 = vmatprep.subr.bf16.mxu0 %v2514_v28  ;;  %1115 = vmatprep.subr.bf16.mxu1 %v2220_v33  ;;  %v2534_v33 = vld [vmem:[#allocation6 + $0x20] ss:$16 sps:$4 sm:$0xff]  }
 0x570   :  { %1075 = vmatpush1.bf16.msra.mxu0 %v2518_v29  ;;  %1116 = vmatpush1.bf16.msra.mxu1 %v2223_v34  ;;  %v2538_v34 = vld [vmem:[#allocation6 + $0x4] ss:$16 sps:$4 sm:$0xff]  }
 0x571   :  { %1076 = vmatprep.subr.bf16.mxu0 %v2522_v30  ;;  %1117 = vmatprep.subr.bf16.mxu1 %v2226_v35  ;;  %v2542_v35 = vld [vmem:[#allocation6] ss:$16 sps:$4 sm:$0xff]  }
 0x574   :  { %1077 = vmatpush1.bf16.msra.mxu0 %v2526_v31  ;;  %1118 = vmatpush1.bf16.msra.mxu1 %v2229_v36  ;;  %v1942_v36 = vld [vmem:[#allocation6 + $0xec] ss:$16 sps:$4 sm:$0xff]  }
 0x575   :  { %1078 = vmatprep.subr.bf16.mxu0 %v2530_v32  ;;  %1119 = vmatprep.subr.bf16.mxu1 %v2232_v37  ;;  %v928_v37 = vld [vmem:[#allocation3 + $0xa0] sm:$0xff] }
 0x578   :  { %1079 = vmatpush1.bf16.msra.mxu0 %v2534_v33  ;;  %1120 = vmatpush1.bf16.msra.mxu1 %v2235_v38  ;;  %v929_v38 = vld [vmem:[#allocation3 + $0xa8] sm:$0xff] }
 0x579   :  { %1080 = vmatprep.subr.bf16.mxu0 %v2538_v34  ;;  %1121 = vmatprep.subr.bf16.mxu1 %v2238_v39 }
 0x57c   :  { %1081 = vmatpush1.bf16.msra.mxu0 %v2542_v35  ;;  %1122 = vmatpush1.bf16.msra.mxu1 %v2241_v40  ;;  %v931_v40 = vld [vmem:[#allocation3 + $0xb8] sm:$0xff] }
 0x57d   :  { %1199 = vmatprep.subr.bf16.mxu0 %v2465_v2  ;;  %1240 = vmatprep.subr.bf16.mxu1 %v1942_v36 }
 0x61f   :  { %v967_v11 = vpop.f32.mrf.mxu0  ;;  %v1008_v12 = vpop.f32.mrf.mxu1 }
 0x620   :  { %v1015_v13 = vadd.f32 %v967_v11, %v928_v37  ;;  %v1017_v57 = vadd.f32 %v1008_v12, %v930_v55 }
 0x621   :  { %v969_v15 = vpop.f32.mrf.mxu0  ;;  %v1010_v16 = vpop.f32.mrf.mxu1 }
 0x622   :  { %v1637_v20 = vmul.f32 -1.442695, %v1015_v13  ;;  %v1016_v52 = vadd.f32 %v969_v15, %v929_v38  ;;  %v1018_v2 = vadd.f32 %v1010_v16, %v931_v40  ;;  %v1943_v15 = vld [vmem:[#allocation6 + $0xe8] ss:$16 sps:$4 sm:$0xff]  }
 0x623   :  { %v971_v39 = vpop.f32.mrf.mxu0  ;;  %v1012_v46 = vpop.f32.mrf.mxu1  ;;  %v1945_v16 = vld [vmem:[#allocation6 + $0xc8] ss:$16 sps:$4 sm:$0xff]  }
 0x624   :  { %1846 = vpow2.f32 %v1637_v20  ;;  %v1638_v51 = vmul.f32 -1.442695, %v1016_v52  ;;  %v1639_v21 = vmul.f32 -1.442695, %v1018_v2  ;;  %v1946_v20 = vld [vmem:[#allocation6 + $0xac] ss:$16 sps:$4 sm:$0xff]  }
 0x625   :  { %v972_v22 = vpop.f32.mrf.mxu0  ;;  %v1013_v53 = vpop.f32.mrf.mxu1  ;;  %v1949_v52 = vld [vmem:[#allocation6 + $0x88] ss:$16 sps:$4 sm:$0xff]  }
 0x626   :  { %1848 = vpow2.f32 %v1638_v51 }
 0x627   :  { %1850 = vpow2.f32 %v1639_v21 }
 0x631   :  { %v1847_v56 = vpop.eup %1846 }
 0x632   :  { %v1022_v59 = vadd.f32 1.0, %v1847_v56 }
 0x633   :  { %v1849_v19 = vpop.eup %1848 }
 0x634   :  { %1852 = vrcp.f32 %v1022_v59  ;;  %v1028_v60 = vadd.f32 1.0, %v1849_v19  ;;  %v1851_v61 = vpop.eup %1850  ;;  %v1063_v59 = vld [vmem:[#allocation3 + $0xd0] sm:$0xff] }
 0x635   :  { %1854 = vtanh.f32 %v1017_v57  ;;  %v1035_v62 = vadd.f32 1.0, %v1851_v61 }
 0x636   :  { %1856 = vrcp.f32 %v1028_v60 }
 0x637   :  { %1858 = vrcp.f32 %v1035_v62 }
 0x641   :  { %v1853_v18 = vpop.eup %1852 }
 0x642   :  { %v1855_v23 = vpop.eup %1854 }
 0x643   :  { %v1857_v24 = vpop.eup %1856  ;;  %v1039_v41 = vmul.f32 %v1855_v23, %v1853_v18 }
 0x644   :  { %v1038_v48 = vmul.f32 %v1857_v24, %v2475_v14  ;;  %v1859_v6 = vpop.eup %1858 }
 0x646   :  { %v1040_v17 = vadd.f32 %v1039_v41, %v1038_v48 }
 0x648   :  { %1860 = vtanh.f32 %v1040_v17  ;;  %v1054_v47 = vsub.f32 %v1040_v17, %v2475_v14 }
 0x64a   :  { %v1055_v3 = vmul.f32 %v1054_v47, %v2549_v49 }
 0x64c   :  { %v2553_v4 = vadd.f32 %v1055_v3, %v2475_v14  ;;  %v1944_v14 = vld [vmem:[#allocation6 + $0xcc] ss:$16 sps:$4 sm:$0xff]  }
 0x655   :  { %v1861_v36 = vpop.eup %1860 }
 0x656   :  { %v1042_v37 = vmul.f32 %v1861_v36, %v1859_v6 }
 0x658   :  { %v1046_v11 = vsub.f32 %v1042_v37, %v2480_v5 }
 0x65a   :  { %v1052_v12 = vmul.f32 %v2549_v49, %v1046_v11  ;;  %v2581_v11 = vpop.permute.xlu0 %1182 }
 0x65c   :  { %v2558_v38 = vadd.f32 %v1052_v12, %v2480_v5 }
 0x65e   :  { %v1065_v13 = vpack.c.bf16 %v2558_v38, %v2558_v38 }
 0x660   :  { %1099 = vmatmul.mubr.bf16.vlgmr.msra.gmra.mxu0 %v1065_v13  ;;  %1140 = vmatmul.mubr.bf16.vlgmr.msra.gmra.mxu1 %v1065_v13 }
 0x661   :  { %1200 = vmatpush1.bf16.msra.mxu0 %v2484_v7  ;;  %1241 = vmatpush1.bf16.msra.mxu1 %v1943_v15  ;;  %v1947_v7 = vld [vmem:[#allocation6 + $0xa8] ss:$16 sps:$4 sm:$0xff]  }
 0x662   :  { %1201 = vmatprep.subr.bf16.mxu0 %v2488_v42  ;;  %1242 = vmatprep.subr.bf16.mxu1 %v1944_v14  ;;  %v1948_v42 = vld [vmem:[#allocation6 + $0x8c] ss:$16 sps:$4 sm:$0xff]  }
 0x663   :  { %1231 = vmatprep.mubr.bf16.mxu0 %v2053_v0  ;;  %1272 = vmatprep.mubr.bf16.mxu1 %v2053_v0  ;;  %v1950_v0 = vld [vmem:[#allocation6 + $0x6c] ss:$16 sps:$4 sm:$0xff]  }
 0x665   :  { %1202 = vmatpush1.bf16.msra.mxu0 %v2494_v8  ;;  %1243 = vmatpush1.bf16.msra.mxu1 %v1945_v16  ;;  %v1951_v8 = vld [vmem:[#allocation6 + $0x68] ss:$16 sps:$4 sm:$0xff]  }
 0x666   :  { %1203 = vmatprep.subr.bf16.mxu0 %v2498_v9  ;;  %1244 = vmatprep.subr.bf16.mxu1 %v1946_v20  ;;  %v1952_v9 = vld [vmem:[#allocation6 + $0x4c] ss:$16 sps:$4 sm:$0xff]  }
 0x669   :  { %1204 = vmatpush1.bf16.msra.mxu0 %v2502_v25  ;;  %1245 = vmatpush1.bf16.msra.mxu1 %v1947_v7  ;;  %v1953_v25 = vld [vmem:[#allocation6 + $0x48] ss:$16 sps:$4 sm:$0xff]  }
 0x66a   :  { %1205 = vmatprep.subr.bf16.mxu0 %v2506_v26  ;;  %1246 = vmatprep.subr.bf16.mxu1 %v1948_v42  ;;  %v1954_v26 = vld [vmem:[#allocation6 + $0x2c] ss:$16 sps:$4 sm:$0xff]   ;;  %v525_v42 = vmul.f32 %v2331_v43, %v2322_v63  ;;  %v1761_v63 = vld [vmem:[#allocation8 + $0x20] sm:$0xff]  }
 0x66b   :  { %v1762_v43 = vld [vmem:[#allocation8 + $0x18] sm:$0xff]  }
 0x66d   :  { %1206 = vmatpush1.bf16.msra.mxu0 %v2510_v10  ;;  %1247 = vmatpush1.bf16.msra.mxu1 %v1949_v52  ;;  %v1955_v10 = vld [vmem:[#allocation6 + $0x28] ss:$16 sps:$4 sm:$0xff]  }
 0x66e   :  { %1207 = vmatprep.subr.bf16.mxu0 %v2514_v28  ;;  %1248 = vmatprep.subr.bf16.mxu1 %v1950_v0  ;;  %v1956_v28 = vld [vmem:[#allocation6 + $0xc] ss:$16 sps:$4 sm:$0xff]   ;;  %v393_v0 = vmul.f32 %v2274_v54, %v2266_v44  ;;  %v1763_v44 = vld [vmem:[#allocation8 + $0x10] sm:$0xff]  }
 0x66f   :  { %v1764_v54 = vld [vmem:[#allocation8 + $0x8] sm:$0xff]  }
 0x671   :  { %1208 = vmatpush1.bf16.msra.mxu0 %v2518_v29  ;;  %1249 = vmatpush1.bf16.msra.mxu1 %v1951_v8  ;;  %v1957_v29 = vld [vmem:[#allocation6 + $0x8] ss:$16 sps:$4 sm:$0xff]   ;;  %v1759_v8 = vld [vmem:[#allocation8 + $0x30] sm:$0xff]  }
 0x672   :  { %1209 = vmatprep.subr.bf16.mxu0 %v2522_v30  ;;  %1250 = vmatprep.subr.bf16.mxu1 %v1952_v9  ;;  %v1758_v30 = vld [vmem:[#allocation8 + $0x38] sm:$0xff]   ;;  %v1331_v9 = vpack.c.bf16 %v525_v42, %v393_v0 }
 0x675   :  { %1210 = vmatpush1.bf16.msra.mxu0 %v2526_v31  ;;  %1251 = vmatpush1.bf16.msra.mxu1 %v1953_v25  ;;  %v1061_v31 = vld [vmem:[#allocation3 + $0xc0] sm:$0xff]  ;;  %v1760_v25 = vld [vmem:[#allocation8 + $0x28] sm:$0xff]  }
 0x676   :  { %1211 = vmatprep.subr.bf16.mxu0 %v2530_v32  ;;  %1252 = vmatprep.subr.bf16.mxu1 %v1954_v26  ;;  %v1062_v32 = vld [vmem:[#allocation3 + $0xc8] sm:$0xff]  ;;  %v1765_v26 = vld [vmem:[#allocation8] sm:$0xff]  }
 0x679   :  { %1212 = vmatpush1.bf16.msra.mxu0 %v2534_v33  ;;  %1253 = vmatpush1.bf16.msra.mxu1 %v1955_v10  ;;  %v791_v10 = vmul.f32 %v2429_v1, %v2420_v27 }
 0x67a   :  { %1213 = vmatprep.subr.bf16.mxu0 %v2538_v34  ;;  %1254 = vmatprep.subr.bf16.mxu1 %v1956_v28  ;;  %v1057_v28 = vmul.f32 %v2558_v38, %v2549_v49 }
 0x67d   :  { %1214 = vmatpush1.bf16.msra.mxu0 %v2542_v35  ;;  %1255 = vmatpush1.bf16.msra.mxu1 %v1957_v29  ;;  %v1064_v35 = vld [vmem:[#allocation3 + $0xd8] sm:$0xff]  ;;  %v658_v29 = vmul.f32 %v2380_v58, %v2370_v50 }
 0x67e   :  { %1670 = vmatprep.subr.bf16.mxu0 %v1758_v30 }
 0x720   :  { %v1100_v39 = vpop.f32.mrf.mxu0  ;;  %v1141_v46 = vpop.f32.mrf.mxu1 }
 0x721   :  { %v1148_v51 = vadd.f32 %v1100_v39, %v1061_v31  ;;  %v1150_v61 = vadd.f32 %v1141_v46, %v1063_v59  ;;  %v1332_v31 = vpack.c.bf16 %v791_v10, %v658_v29  ;;  %v1194_v46 = vld [vmem:[#allocation3 + $0xe0] sm:$0xff] }
 0x722   :  { %v1102_v22 = vpop.f32.mrf.mxu0  ;;  %v1143_v53 = vpop.f32.mrf.mxu1 }
 0x723   :  { %v1641_v33 = vmul.f32 -1.442695, %v1148_v51  ;;  %v1149_v40 = vadd.f32 %v1102_v22, %v1062_v32  ;;  %v1151_v57 = vadd.f32 %v1143_v53, %v1064_v35  ;;  %v1195_v22 = vld [vmem:[#allocation3 + $0xe8] sm:$0xff] }
 0x724   :  { %v1104_v2 = vpop.f32.mrf.mxu0  ;;  %v1145_v55 = vpop.f32.mrf.mxu1 }
 0x725   :  { %1862 = vpow2.f32 %v1641_v33  ;;  %v1642_v34 = vmul.f32 -1.442695, %v1149_v40  ;;  %v1643_v19 = vmul.f32 -1.442695, %v1151_v57  ;;  %v1196_v55 = vld [vmem:[#allocation3 + $0xf0] sm:$0xff] }
 0x726   :  { %v1105_v21 = vpop.f32.mrf.mxu0  ;;  %v1146_v56 = vpop.f32.mrf.mxu1 }
 0x727   :  { %1864 = vpow2.f32 %v1642_v34 }
 0x728   :  { %1866 = vpow2.f32 %v1643_v19  ;;  %v1649_v19 = vld [vmem:[%s2691_s6] ss:$0 sm:$0xff]  ;;  %s2055_s6 = smov [#allocation9]  }
 0x729   :  { %s1572_s24 = sshll.u32 %s2055_s6, 4  ;;  %s1573_s24 = int_to_ptr.vmem [resolvable:$true] %s1572_s24 }
 0x72a   :  { %s2018_s25 = scalar_lea.vmem %s1573_s24, 1024  ;;  %p2023_p2 = scmp.lt.s32.totalorder %s1573_s24, %s1573_s24 }
 0x72b   :  { %p2019_p1 = scmp.ne.s32.totalorder %s1573_s24, %s2018_s25  ;;  %p2024_p3 = scmp.lt.s32.totalorder %s2018_s25, %s2018_s25 }
 0x72d   :  { %p2025_p4 = por %p2024_p3, %p2023_p2 }
 0x72f   :  { %p2026_p5 = pnand %p2025_p4, %p2019_p1 }
 0x732   :  { %v1863_v60 = vpop.eup %1862 }
 0x733   :  { %v1155_v18 = vadd.f32 1.0, %v1863_v60 }
 0x734   :  { %v1865_v23 = vpop.eup %1864 }
 0x735   :  { %1868 = vrcp.f32 %v1155_v18  ;;  %v1161_v24 = vadd.f32 1.0, %v1865_v23  ;;  %v1867_v62 = vpop.eup %1866 }
 0x736   :  { %1870 = vtanh.f32 %v1150_v61  ;;  %v1168_v47 = vadd.f32 1.0, %v1867_v62 }
 0x737   :  { %1872 = vrcp.f32 %v1161_v24 }
 0x738   :  { %1874 = vrcp.f32 %v1168_v47 }
 0x742   :  { %v1869_v41 = vpop.eup %1868 }
 0x743   :  { %v1871_v48 = vpop.eup %1870 }
 0x744   :  { %v1873_v17 = vpop.eup %1872  ;;  %v1172_v3 = vmul.f32 %v1871_v48, %v1869_v41 }
 0x745   :  { %v1171_v6 = vmul.f32 %v1873_v17, %v2553_v4  ;;  %v1875_v15 = vpop.eup %1874 }
 0x747   :  { %v1173_v36 = vadd.f32 %v1172_v3, %v1171_v6 }
 0x749   :  { %1876 = vtanh.f32 %v1173_v36  ;;  %v1187_v37 = vsub.f32 %v1173_v36, %v2553_v4 }
 0x74b   :  { %v1188_v12 = vmul.f32 %v1187_v37, %v2581_v11 }
 0x74d   :  { %v2585_v13 = vadd.f32 %v1188_v12, %v2553_v4 }
 0x756   :  { %v1877_v14 = vpop.eup %1876 }
 0x757   :  { %v1175_v16 = vmul.f32 %v1877_v14, %v1875_v15 }
 0x759   :  { %v1179_v20 = vsub.f32 %v1175_v16, %v2558_v38 }
 0x75b   :  { %v1185_v7 = vmul.f32 %v2581_v11, %v1179_v20 }
 0x75d   :  { %v2592_v52 = vadd.f32 %v1185_v7, %v2558_v38  ;;  %v1316_v7 = vpop.permute.xlu1 %1315 }
 0x75f   :  { %v1198_v4 = vpack.c.bf16 %v2592_v52, %v2592_v52 }
 0x761   :  { %1232 = vmatmul.mubr.bf16.vlgmr.msra.gmra.mxu0 %v1198_v4  ;;  %1273 = vmatmul.mubr.bf16.vlgmr.msra.gmra.mxu1 %v1198_v4  ;;  %v1190_v4 = vmul.f32 %v2592_v52, %v2581_v11 }
 0x762   :  { %1671 = vmatpush3.bf16.msra.mxu0 %v1758_v30  ;;  %1686 = vmatprep.mubr.bf16.mxu0 %v1331_v9  ;;  %v924_v30 = vmul.f32 %v2480_v5, %v2471_v45  ;;  %v1197_v45 = vld [vmem:[#allocation3 + $0xf8] sm:$0xff] }
 0x763   :  { %1672 = vmatprep.subr.bf16.mxu0 %v1759_v8 }
 0x764   :  { %v1333_v39 = vpack.c.bf16 %v1057_v28, %v924_v30 }
 0x766   :  { %1673 = vmatpush3.bf16.msra.mxu0 %v1759_v8 }
 0x767   :  { %1674 = vmatprep.subr.bf16.mxu0 %v1760_v25 }
 0x76a   :  { %1675 = vmatpush3.bf16.msra.mxu0 %v1760_v25 }
 0x76b   :  { %1676 = vmatprep.subr.bf16.mxu0 %v1761_v63 }
 0x76e   :  { %1677 = vmatpush3.bf16.msra.mxu0 %v1761_v63 }
 0x76f   :  { %1678 = vmatprep.subr.bf16.mxu0 %v1762_v43 }
 0x772   :  { %1679 = vmatpush3.bf16.msra.mxu0 %v1762_v43 }
 0x773   :  { %1680 = vmatprep.subr.bf16.mxu0 %v1763_v44 }
 0x776   :  { %1681 = vmatpush3.bf16.msra.mxu0 %v1763_v44 }
 0x777   :  { %1682 = vmatprep.subr.bf16.mxu0 %v1764_v54 }
 0x77a   :  { %1683 = vmatpush3.bf16.msra.mxu0 %v1764_v54 }
 0x77b   :  { %1684 = vmatprep.subr.bf16.mxu0 %v1765_v26 }
 0x77e   :  { %1685 = vmatpush3.bf16.msra.mxu0 %v1765_v26 }
 0x781   :  { %1687 = vmatmul.mubr.bf16.vlgmr.msra.gmra.mxu0 %v1332_v31 }
 0x782   :  { %1690 = vmatprep.mubr.bf16.mxu0 %v1333_v39 }
 0x821   :  { %v1233_v32 = vpop.f32.mrf.mxu0  ;;  %v1274_v51 = vpop.f32.mrf.mxu1 }
 0x822   :  { %v1281_v53 = vadd.f32 %v1233_v32, %v1194_v46  ;;  %v1283_v56 = vadd.f32 %v1274_v51, %v1196_v55 }
 0x823   :  { %v1235_v27 = vpop.f32.mrf.mxu0  ;;  %v1276_v1 = vpop.f32.mrf.mxu1 }
 0x824   :  { %v1645_v33 = vmul.f32 -1.442695, %v1281_v53  ;;  %v1282_v49 = vadd.f32 %v1235_v27, %v1195_v22  ;;  %v1284_v5 = vadd.f32 %v1276_v1, %v1197_v45 }
 0x825   :  { %v1237_v38 = vpop.f32.mrf.mxu0  ;;  %v1278_v40 = vpop.f32.mrf.mxu1 }
 0x826   :  { %1878 = vpow2.f32 %v1645_v33  ;;  %v1646_v50 = vmul.f32 -1.442695, %v1282_v49  ;;  %v1647_v34 = vmul.f32 -1.442695, %v1284_v5 }
 0x827   :  { %v1238_v58 = vpop.f32.mrf.mxu0  ;;  %v1279_v2 = vpop.f32.mrf.mxu1 }
 0x828   :  { %1880 = vpow2.f32 %v1646_v50 }
 0x829   :  { %1882 = vpow2.f32 %v1647_v34 }
 0x833   :  { %v1879_v21 = vpop.eup %1878 }
 0x834   :  { %v1288_v35 = vadd.f32 1.0, %v1879_v21 }
 0x835   :  { %v1881_v57 = vpop.eup %1880 }
 0x836   :  { %1884 = vrcp.f32 %v1288_v35  ;;  %v1294_v59 = vadd.f32 1.0, %v1881_v57  ;;  %v1883_v61 = vpop.eup %1882 }
 0x837   :  { %1886 = vtanh.f32 %v1283_v56  ;;  %v1301_v48 = vadd.f32 1.0, %v1883_v61 }
 0x838   :  { %1888 = vrcp.f32 %v1294_v59 }
 0x839   :  { %1890 = vrcp.f32 %v1301_v48 }
 0x841   :  { %v1688_v60 = vpop.f32.mrf.mxu0 }
 0x842   :  { %v2609_v18 = vadd.f32 %v1688_v60, %v1649_v19 }
 0x843   :  { %v1885_v23 = vpop.eup %1884  ;;  %v1440_v24 = vpop.f32.mrf.mxu0 }
 0x844   :  { %v1887_v62 = vpop.eup %1886  ;;  %1475 = vmax.xlane.f32.xlu0 %v2609_v18  ;;  %v2613_v6 = vadd.f32 %v1649_v19, %v1440_v24 }
 0x845   :  { %v1889_v41 = vpop.eup %1888  ;;  %v1689_v17 = vpop.f32.mrf.mxu0  ;;  %v1305_v47 = vmul.f32 %v1887_v62, %v1885_v23 }
 0x846   :  { %v1304_v3 = vmul.f32 %v1889_v41, %v2585_v13  ;;  %v2618_v15 = vadd.f32 %v1689_v17, %v1649_v19  ;;  %v1891_v14 = vpop.eup %1890 }
 0x847   :  { %v1443_v36 = vpop.f32.mrf.mxu0 }
 0x848   :  { %v1306_v37 = vadd.f32 %v1305_v47, %v1304_v3  ;;  %v2615_v12 = vadd.f32 %v1649_v19, %v1443_v36  ;;  %1471 = vmax.xlane.f32.xlu0 %v2613_v6 }
 0x84a   :  { %1892 = vtanh.f32 %v1306_v37  ;;  %1473 = vmax.xlane.f32.xlu1 %v2615_v12 }
 0x84c   :  { %1477 = vmax.xlane.f32.xlu0 %v2618_v15 }
 0x857   :  { %v1893_v16 = vpop.eup %1892 }
 0x858   :  { %v1308_v20 = vmul.f32 %v1893_v16, %v1891_v14 }
 0x85a   :  { %v1312_v13 = vsub.f32 %v1308_v20, %v2592_v52 }
 0x85c   :  { %v1318_v42 = vmul.f32 %v1316_v7, %v1312_v13 }
 0x85e   :  { %v1319_v0 = vadd.f32 %v1318_v42, %v2592_v52 }
 0x860   :  { %v1320_v8 = vmul.f32 %v1319_v0, %v1316_v7 }
 0x862   :  { %v1334_v9 = vpack.c.bf16 %v1320_v8, %v1190_v4 }
 0x864   :  { %1691 = vmatmul.mubr.bf16.gmra.mxu0 %v1334_v9 }
 0x8cd   :  { %v2626_v25 = vpop.xlane.xlu0 %1475 }
 0x8ce   :  { %v1489_v54 = vsub.f32 %v2609_v18, %v2626_v25 }
 0x8d0   :  { %v1499_v52 = vmul.f32 1.442695, %v1489_v54 }
 0x8d1   :  { %v2628_v63 = vpop.xlane.xlu0 %1471 }
 0x8d2   :  { %v1487_v43 = vsub.f32 %v2613_v6, %v2628_v63 }
 0x8d3   :  { %v2632_v44 = vpop.xlane.xlu1 %1473 }
 0x8d4   :  { %v1495_v26 = vmul.f32 1.442695, %v1487_v43  ;;  %v1488_v10 = vsub.f32 %v2615_v12, %v2632_v44 }
 0x8d5   :  { %v2638_v11 = vpop.xlane.xlu0 %1477 }
 0x8d6   :  { %1894 = vpow2.f32 %v1495_v26  ;;  %v1497_v28 = vmul.f32 1.442695, %v1488_v10  ;;  %v1490_v29 = vsub.f32 %v2618_v15, %v2638_v11 }
 0x8d7   :  { %1896 = vpow2.f32 %v1499_v52 }
 0x8d8   :  { %1898 = vpow2.f32 %v1497_v28  ;;  %v1501_v39 = vmul.f32 1.442695, %v1490_v29 }
 0x8da   :  { %1900 = vpow2.f32 %v1501_v39 }
 0x8e3   :  { %v1895_v1 = vpop.eup %1894 }
 0x8e4   :  { %v1897_v33 = vpop.eup %1896 }
 0x8e5   :  { %v1899_v49 = vpop.eup %1898 }
 0x8e7   :  { %v1901_v38 = vpop.eup %1900 }
 0x924   :  { %v1692_v30 = vpop.f32.mrf.mxu0 }
 0x925   :  { %v2645_v22 = vadd.f32 %v1692_v30, %v1649_v19 }
 0x926   :  { %v1456_v31 = vpop.f32.mrf.mxu0 }
 0x927   :  { %v2642_v46 = vadd.f32 %v1649_v19, %v1456_v31 }
 0x928   :  { %v1693_v32 = vpop.f32.mrf.mxu0 }
 0x929   :  { %1479 = vmax.xlane.f32.xlu1 %v2642_v46  ;;  %v2651_v27 = vadd.f32 %v1693_v32, %v1649_v19 }
 0x92a   :  { %v1459_v51 = vpop.f32.mrf.mxu0 }
 0x92b   :  { %v2647_v53 = vadd.f32 %v1649_v19, %v1459_v51 }
 0x92d   :  { %1481 = vmax.xlane.f32.xlu0 %v2647_v53  ;;  %1483 = vmax.xlane.f32.xlu1 %v2645_v22 }
 0x931   :  { %1485 = vmax.xlane.f32.xlu0 %v2651_v27  ;;  %1511 = vadd.xlane.f32.xlu1 %v1895_v1 }
 0x935   :  { %1513 = vadd.xlane.f32.xlu0 %v1899_v49  ;;  %1515 = vadd.xlane.f32.xlu1 %v1897_v33 }
 0x939   :  { %1517 = vadd.xlane.f32.xlu0 %v1901_v38 }
 0x9b2   :  { %v1480_v40 = vpop.xlane.xlu1 %1479 }
 0x9b3   :  { %v1491_v50 = vsub.f32 %v2642_v46, %v1480_v40 }
 0x9b5   :  { %v1503_v58 = vmul.f32 1.442695, %v1491_v50 }
 0x9b6   :  { %v2655_v2 = vpop.xlane.xlu0 %1481  ;;  %v2657_v45 = vpop.xlane.xlu1 %1483 }
 0x9b7   :  { %1902 = vpow2.f32 %v1503_v58  ;;  %v1492_v5 = vsub.f32 %v2647_v53, %v2655_v2  ;;  %v1493_v55 = vsub.f32 %v2645_v22, %v2657_v45 }
 0x9b9   :  { %v1505_v34 = vmul.f32 1.442695, %v1492_v5  ;;  %v1507_v21 = vmul.f32 1.442695, %v1493_v55 }
 0x9ba   :  { %v2663_v56 = vpop.xlane.xlu0 %1485  ;;  %v1512_v35 = vpop.xlane.xlu1 %1511 }
 0x9bb   :  { %1904 = vpow2.f32 %v1505_v34  ;;  %v1494_v57 = vsub.f32 %v2651_v27, %v2663_v56 }
 0x9bc   :  { %1906 = vpow2.f32 %v1507_v21 }
 0x9bd   :  { %v1509_v59 = vmul.f32 1.442695, %v1494_v57  ;;  %1908 = vlog2.f32 %v1512_v35 }
 0x9be   :  { %v1514_v19 = vpop.xlane.xlu0 %1513  ;;  %v1516_v60 = vpop.xlane.xlu1 %1515 }
 0x9bf   :  { %1910 = vpow2.f32 %v1509_v59 }
 0x9c0   :  { %1912 = vlog2.f32 %v1514_v19 }
 0x9c1   :  { %1914 = vlog2.f32 %v1516_v60 }
 0x9c2   :  { %v1518_v61 = vpop.xlane.xlu0 %1517 }
 0x9c3   :  { %1916 = vlog2.f32 %v1518_v61 }
 0x9c4   :  { %v1903_v23 = vpop.eup %1902 }
 0x9c5   :  { %1519 = vadd.xlane.f32.xlu1 %v1903_v23 }
 0x9c8   :  { %v1905_v24 = vpop.eup %1904 }
 0x9c9   :  { %v1907_v62 = vpop.eup %1906  ;;  %1521 = vadd.xlane.f32.xlu0 %v1905_v24 }
 0x9ca   :  { %v1909_v41 = vpop.eup %1908  ;;  %1523 = vadd.xlane.f32.xlu1 %v1907_v62 }
 0x9cb   :  { %v1528_v48 = vmul.f32 0.6931472, %v1909_v41 }
 0x9cc   :  { %v1911_v17 = vpop.eup %1910 }
 0x9cd   :  { %v1913_v47 = vpop.eup %1912  ;;  %v1543_v3 = vadd.f32 %v1528_v48, %v2628_v63  ;;  %1525 = vadd.xlane.f32.xlu0 %v1911_v17 }
 0x9ce   :  { %v1915_v36 = vpop.eup %1914  ;;  %v1530_v37 = vmul.f32 0.6931472, %v1913_v47 }
 0x9cf   :  { %v1551_v14 = vsub.f32 %v2613_v6, %v1543_v3  ;;  %v1532_v16 = vmul.f32 0.6931472, %v1915_v36 }
 0x9d0   :  { %v1917_v20 = vpop.eup %1916  ;;  %v1544_v13 = vadd.f32 %v1530_v37, %v2632_v44 }
 0x9d1   :  { %1559 = vst [vmem:[#allocation9] sm:$0xff] %v1551_v14  ;;  %v1545_v7 = vadd.f32 %v1532_v16, %v2626_v25  ;;  %v1534_v42 = vmul.f32 0.6931472, %v1917_v20 }
 0x9d2   :  { %v1552_v0 = vsub.f32 %v2615_v12, %v1544_v13 }
 0x9d3   :  { %v1553_v4 = vsub.f32 %v2609_v18, %v1545_v7  ;;  %v1546_v8 = vadd.f32 %v1534_v42, %v2638_v11 }
 0x9d4   :  { %1560 = vst [vmem:[#allocation9 + $0x8] sm:$0xff] %v1552_v0 }
 0x9d5   :  { %1561 = vst [vmem:[#allocation9 + $0x10] sm:$0xff] %v1553_v4  ;;  %v1554_v9 = vsub.f32 %v2618_v15, %v1546_v8 }
 0x9d7   :  { %1562 = vst [vmem:[#allocation9 + $0x18] sm:$0xff] %v1554_v9 }
 0xa4e   :  { %v1520_v6 = vpop.xlane.xlu1 %1519 }
 0xa4f   :  { %1918 = vlog2.f32 %v1520_v6 }
 0xa52   :  { %v1522_v63 = vpop.xlane.xlu0 %1521 }
 0xa53   :  { %1920 = vlog2.f32 %v1522_v63  ;;  %v1524_v43 = vpop.xlane.xlu1 %1523 }
 0xa54   :  { %1922 = vlog2.f32 %v1524_v43 }
 0xa56   :  { %v1526_v44 = vpop.xlane.xlu0 %1525 }
 0xa57   :  { %1924 = vlog2.f32 %v1526_v44 }
 0xa5c   :  { %v1919_v25 = vpop.eup %1918 }
 0xa5d   :  { %v1536_v54 = vmul.f32 0.6931472, %v1919_v25 }
 0xa5f   :  { %v1547_v12 = vadd.f32 %v1536_v54, %v1480_v40 }
 0xa60   :  { %v1921_v26 = vpop.eup %1920 }
 0xa61   :  { %v1923_v18 = vpop.eup %1922  ;;  %v1555_v10 = vsub.f32 %v2642_v46, %v1547_v12  ;;  %v1538_v11 = vmul.f32 0.6931472, %v1921_v26 }
 0xa62   :  { %v1540_v52 = vmul.f32 0.6931472, %v1923_v18 }
 0xa63   :  { %1563 = vst [vmem:[#allocation9 + $0x20] sm:$0xff] %v1555_v10  ;;  %v1548_v15 = vadd.f32 %v1538_v11, %v2655_v2 }
 0xa64   :  { %v1925_v28 = vpop.eup %1924  ;;  %v1549_v29 = vadd.f32 %v1540_v52, %v2657_v45 }
 0xa65   :  { %v1556_v30 = vsub.f32 %v2647_v53, %v1548_v15  ;;  %v1542_v31 = vmul.f32 0.6931472, %v1925_v28 }
 0xa66   :  { %v1557_v39 = vsub.f32 %v2645_v22, %v1549_v29 }
 0xa67   :  { %1564 = vst [vmem:[#allocation9 + $0x28] sm:$0xff] %v1556_v30  ;;  %v1550_v32 = vadd.f32 %v1542_v31, %v2663_v56 }
 0xa68   :  { %1565 = vst [vmem:[#allocation9 + $0x30] sm:$0xff] %v1557_v39 }
 0xa69   :  { %v1558_v46 = vsub.f32 %v2651_v27, %v1550_v32 }
 0xa6b   :  { %1566 = vst [vmem:[#allocation9 + $0x38] sm:$0xff] %v1558_v46 }
 0xa6c   :  { %2029 = shalt.err (!%p2026_p5)
}
 0xa6d   :  { %s2056_s26 = smov 128   ;;  %s2057_s27 = smov 8  }
 0xa6e   :  { %1578 = dma.vmem_to_hbm [thread:$0]  %s1573_s24, 1024, %s2692_s7, [#allocation5], %s2056_s26, %s2056_s26, %s2057_s27  }
 0xa6f   :  { %2042 = dma.done.wait [#allocation5], 1024  }
 0xa70   :  { %2043 = vsyncadd [#allocation5], 4294966272 }
 0xa71   :  { %1582 = vsyncpa [#allocation4], 1 }
 0xa72   :  { %1583 = vsyncpa [#allocation7], 1 }
 0xa73   :  { %1584 = vsyncpa [#allocation5], 1 }

</bundles_post_ra>
